<compile_context>
chip_gen: v6e
topology: v6e:2x2x1
jax: 0.10.0
libtpu: 0.0.40
codegen_flags: <defaults>
</compile_context>

<pallas_src>
import functools

import jax
import jax.numpy as jnp
from jax.experimental import pallas as pl
from jax.experimental.pallas import tpu as pltpu


def _dwconv_kernel(x_ref, top_ref, bot_ref, w_ref, b_ref, o_ref, xh_ref, *, padl):
    # x_ref:   (1, TH, W, CT)        row tile of the input
    # top_ref: (1, 1,  W, CT)        row just above the tile (clamped at image top)
    # bot_ref: (1, 1,  W, CT)        row just below the tile (clamped at image bottom)
    # w_ref:   (3, 3, CT)            depthwise weights, (kh, kw, c)
    # b_ref:   (1, CT)               bias
    # o_ref:   (1, TH, W, CT)        output row tile
    # xh_ref:  (TH+2, W+2*padl, CT)  VMEM scratch holding the zero-padded tile
    _, TH, W, CT = x_ref.shape
    h = pl.program_id(2)
    nh = pl.num_programs(2)

    # ---- assemble the zero-padded halo tile in VMEM -------------------------
    # Zero the whole scratch (covers the left/right zero columns and the halo
    # rows of boundary tiles), then overwrite the interior.  Every store is
    # sublane-aligned because the data region starts at column `padl`.
    xh_ref[...] = jnp.zeros(xh_ref.shape, xh_ref.dtype)
    xh_ref[1:TH + 1, padl:padl + W, :] = x_ref[0]

    @pl.when(h > 0)
    def _():
        xh_ref[0:1, padl:padl + W, :] = top_ref[0]

    @pl.when(h < nh - 1)
    def _():
        xh_ref[TH + 1:TH + 2, padl:padl + W, :] = bot_ref[0]

    xh = xh_ref[...]                                         # (TH+2, W+2*padl, CT)

    # ---- three W-shifted views, built once and reused for all 3 dh taps -----
    x0 = xh[:, padl - 1:padl - 1 + W, :].astype(jnp.float32)  # value at (w - 1)
    x1 = xh[:, padl:padl + W, :].astype(jnp.float32)          # value at  w
    x2 = xh[:, padl + 1:padl + 1 + W, :].astype(jnp.float32)  # value at (w + 1)

    w = w_ref[...].astype(jnp.float32)                        # (3, 3, CT)
    b = b_ref[...].astype(jnp.float32)                        # (1, CT)

    # Bias folded into the accumulator init; 9 multiply-accumulate passes.
    acc = jnp.broadcast_to(b[0][None, None, :], (TH, W, CT))
    for dh in range(3):
        sl = slice(dh, dh + TH)                               # major-dim slice (cheap)
        acc = acc + x0[sl] * w[dh, 0][None, None, :]
        acc = acc + x1[sl] * w[dh, 1][None, None, :]
        acc = acc + x2[sl] * w[dh, 2][None, None, :]

    o_ref[0] = acc.astype(o_ref.dtype)


def _pick_h_tile(H, target=16):
    """Largest divisor of H that is <= target, so row tiles evenly cover H."""
    t = min(H, target)
    while H % t:
        t -= 1
    return t


def _pick_c_tile(C, target=256):
    """Lane-aligned channel tile: a multiple of 128 dividing C, else all of C."""
    if C % 128 == 0:
        for t in (target, 128):
            if t <= C and C % t == 0:
                return t
    return C


def dwconv(x, weight, bias, H, W, *, h_tile=None, c_tile=None):
    """Depthwise 3x3 conv, stride 1, pad 1, groups=C, with bias (DWConv.forward).

    x: (B, N, C) with N == H * W.
    weight: (3, 3, C) -- (kh, kw, c); torch weight (C, 1, 3, 3) maps via
            weight[kh, kw, c] == torch_weight[c, 0, kh, kw].
    bias: (C,)
    Returns (B, N, C).
    """
    B, N, C = x.shape
    assert N == H * W, (N, H, W)
    assert weight.shape == (3, 3, C)
    assert bias.shape == (C,)

    th = h_tile if h_tile is not None else _pick_h_tile(H)
    ct = c_tile if c_tile is not None else _pick_c_tile(C)
    assert H % th == 0 and C % ct == 0, (H, th, C, ct)
    nh = H // th
    nc = C // ct

    # (B, N, C) -> (B, H, W, C) is a free reshape (no HBM round-trip, unlike jnp.pad).
    x_nhwc = x.reshape(B, H, W, C)
    bias2d = bias.reshape(1, C)

    # Sublane-aligned left pad inside the VMEM scratch (8 rows f32 / 16 rows bf16).
    padl = 8 * max(1, 4 // jnp.dtype(x.dtype).itemsize)

    kernel = functools.partial(_dwconv_kernel, padl=padl)

    out = pl.pallas_call(
        kernel,
        out_shape=jax.ShapeDtypeStruct((B, H, W, C), x.dtype),
        grid_spec=pltpu.PrefetchScalarGridSpec(
            num_scalar_prefetch=0,
            grid=(B, nc, nh),
            in_specs=[
                # Row tile of the image.
                pl.BlockSpec((1, th, W, ct), lambda b, c, h: (b, h, 0, c)),
                # Halo row above (clamped at the top; zeroed in-kernel when h == 0).
                pl.BlockSpec((1, 1, W, ct),
                             lambda b, c, h: (b, jnp.maximum(h * th - 1, 0), 0, c)),
                # Halo row below (clamped at the bottom; zeroed when h == nh - 1).
                pl.BlockSpec((1, 1, W, ct),
                             lambda b, c, h: (b, jnp.minimum((h + 1) * th, H - 1), 0, c)),
                # Depthwise weights / bias for this channel tile.
                pl.BlockSpec((3, 3, ct), lambda b, c, h: (0, 0, c)),
                pl.BlockSpec((1, ct), lambda b, c, h: (0, c)),
            ],
            out_specs=pl.BlockSpec((1, th, W, ct), lambda b, c, h: (b, h, 0, c)),
            scratch_shapes=[pltpu.VMEM((th + 2, W + 2 * padl, ct), x.dtype)],
        ),
        compiler_params=pltpu.CompilerParams(
            # No cross-step dependencies: all three axes are independent, so they
            # can be split across TensorCores and freely reordered.
            dimension_semantics=("parallel", "parallel", "parallel"),
            vmem_limit_bytes=32 * 1024 * 1024,
        ),
    )(x_nhwc, x_nhwc, x_nhwc, weight, bias2d)

    return out.reshape(B, N, C)


def dwconv_ref(x, weight, bias, H, W):
    """Pure-JAX reference (lax depthwise conv) for correctness checking."""
    B, N, C = x.shape
    x_nchw = jnp.transpose(x, (0, 2, 1)).reshape(B, C, H, W)
    w_oihw = jnp.transpose(weight, (2, 0, 1))[:, None, :, :]   # (C, 1, 3, 3)
    y = jax.lax.conv_general_dilated(
        x_nchw, w_oihw,
        window_strides=(1, 1), padding=((1, 1), (1, 1)),
        feature_group_count=C,
        dimension_numbers=("NCHW", "OIHW", "NCHW"),
    )
    y = y + bias[None, :, None, None]
    return jnp.transpose(y.reshape(B, C, H * W), (0, 2, 1))


def _check(B, H, W, C, key, **kwargs):
    N = H * W
    kx, kkw, kkb = jax.random.split(key, 3)
    x = jax.random.normal(kx, (B, N, C), dtype=jnp.float32)
    weight = jax.random.normal(kkw, (3, 3, C), dtype=jnp.float32) * (1.0 / 3.0)
    bias = jax.random.normal(kkb, (C,), dtype=jnp.float32) * 0.1

    out = jax.block_until_ready(dwconv(x, weight, bias, H, W, **kwargs))
    ref = jax.block_until_ready(dwconv_ref(x, weight, bias, H, W))
    assert out.shape == (B, N, C), out.shape
    err = float(jnp.max(jnp.abs(out - ref)))
    assert jnp.allclose(out, ref, atol=1e-4, rtol=1e-4), err


if __name__ == "__main__":
    key = jax.random.PRNGKey(0)
    k1, k2 = jax.random.split(key)
    # Small PVTv2-ish early stage; h_tile=8 exercises interior halo rows (2 H tiles).
    _check(B=2, H=16, W=16, C=32, key=k1, h_tile=8)
    # Exercises the channel-tile grid axis (256 channels -> two 128-lane tiles).
    _check(B=1, H=8, W=8, C=256, key=k2, c_tile=128)
    print("KERNEL_OK")
</pallas_src>

<mosaic_0001>
module attributes {stable_mosaic.version = 11 : i64} {
  func.func @_dwconv_kernel(%arg0: i32, %arg1: i32, %arg2: i32, %arg3: memref<1x8x16x32xf32, #tpu.memory_space<vmem>>, %arg4: memref<1x1x16x32xf32, #tpu.memory_space<vmem>>, %arg5: memref<1x1x16x32xf32, #tpu.memory_space<vmem>>, %arg6: memref<3x3x32xf32, #tpu.memory_space<vmem>>, %arg7: memref<1x32xf32, #tpu.memory_space<vmem>>, %arg8: memref<1x8x16x32xf32, #tpu.memory_space<vmem>>, %arg9: memref<10x32x32xf32, #tpu.memory_space<vmem>>) attributes {dimension_semantics = [#tpu.dimension_semantics<parallel>, #tpu.dimension_semantics<parallel>, #tpu.dimension_semantics<parallel>], iteration_bounds = array<i64: 2, 1, 2>, scalar_prefetch = 0 : i64, scratch_operands = 1 : i64, tpu.core_type = #tpu.core_type<tc>, window_params = [{transform_indices = @transform_0, window_bounds = array<i64: 1, 8, 16, 32>}, {transform_indices = @transform_1, window_bounds = array<i64: 1, 1, 16, 32>}, {transform_indices = @transform_2, window_bounds = array<i64: 1, 1, 16, 32>}, {transform_indices = @transform_3, window_bounds = array<i64: 3, 3, 32>}, {transform_indices = @transform_4, window_bounds = array<i64: 1, 32>}, {transform_indices = @transform_5, window_bounds = array<i64: 1, 8, 16, 32>}]} {
    %cst = arith.constant 0.000000e+00 : f32
    %0 = vector.broadcast %cst : f32 to vector<10x32x32xf32>
    %c0 = arith.constant 0 : index
    %c0_0 = arith.constant 0 : index
    %c0_1 = arith.constant 0 : index
    %1 = vector.load %arg9[%c0, %c0_0, %c0_1] : memref<10x32x32xf32, #tpu.memory_space<vmem>>, vector<10x32x32xf32>
    tpu.vector_store %arg9[%c0, %c0_0, %c0_1], %0 {strides = array<i32>} : memref<10x32x32xf32, #tpu.memory_space<vmem>>, vector<10x32x32xf32>,
    %c0_2 = arith.constant 0 : index
    %c0_3 = arith.constant 0 : index
    %c0_4 = arith.constant 0 : index
    %c0_5 = arith.constant 0 : index
    %2 = vector.load %arg3[%c0_2, %c0_3, %c0_4, %c0_5] : memref<1x8x16x32xf32, #tpu.memory_space<vmem>>, vector<1x8x16x32xf32>
    %3 = vector.shape_cast %2 : vector<1x8x16x32xf32> to vector<8x16x32xf32>
    %c1 = arith.constant 1 : index
    %c8 = arith.constant 8 : index
    %c0_6 = arith.constant 0 : index
    %4 = vector.load %arg9[%c1, %c8, %c0_6] : memref<10x32x32xf32, #tpu.memory_space<vmem>>, vector<8x16x32xf32>
    tpu.vector_store %arg9[%c1, %c8, %c0_6], %3 {strides = array<i32>} : memref<10x32x32xf32, #tpu.memory_space<vmem>>, vector<8x16x32xf32>,
    %c0_i32 = arith.constant 0 : i32
    %5 = arith.cmpi sgt, %arg2, %c0_i32 : i32
    %6 = arith.extui %5 : i1 to i32
    %c0_i32_7 = arith.constant 0 : i32
    %7 = arith.cmpi ne, %6, %c0_i32_7 : i32
    scf.if %7 {
      %c0_21 = arith.constant 0 : index
      %c0_22 = arith.constant 0 : index
      %c0_23 = arith.constant 0 : index
      %c0_24 = arith.constant 0 : index
      %87 = vector.load %arg4[%c0_21, %c0_22, %c0_23, %c0_24] : memref<1x1x16x32xf32, #tpu.memory_space<vmem>>, vector<1x1x16x32xf32>
      %88 = vector.shape_cast %87 : vector<1x1x16x32xf32> to vector<1x16x32xf32>
      %c0_25 = arith.constant 0 : index
      %c8_26 = arith.constant 8 : index
      %c0_27 = arith.constant 0 : index
      %89 = vector.load %arg9[%c0_25, %c8_26, %c0_27] : memref<10x32x32xf32, #tpu.memory_space<vmem>>, vector<1x16x32xf32>
      tpu.vector_store %arg9[%c0_25, %c8_26, %c0_27], %88 {strides = array<i32>} : memref<10x32x32xf32, #tpu.memory_space<vmem>>, vector<1x16x32xf32>,
    } else {
    }
    %c1_i32 = arith.constant 1 : i32
    %8 = arith.cmpi slt, %arg2, %c1_i32 : i32
    %9 = arith.extui %8 : i1 to i32
    %c0_i32_8 = arith.constant 0 : i32
    %10 = arith.cmpi ne, %9, %c0_i32_8 : i32
    scf.if %10 {
      %c0_21 = arith.constant 0 : index
      %c0_22 = arith.constant 0 : index
      %c0_23 = arith.constant 0 : index
      %c0_24 = arith.constant 0 : index
      %87 = vector.load %arg5[%c0_21, %c0_22, %c0_23, %c0_24] : memref<1x1x16x32xf32, #tpu.memory_space<vmem>>, vector<1x1x16x32xf32>
      %88 = vector.shape_cast %87 : vector<1x1x16x32xf32> to vector<1x16x32xf32>
      %c9 = arith.constant 9 : index
      %c8_25 = arith.constant 8 : index
      %c0_26 = arith.constant 0 : index
      %89 = vector.load %arg9[%c9, %c8_25, %c0_26] : memref<10x32x32xf32, #tpu.memory_space<vmem>>, vector<1x16x32xf32>
      tpu.vector_store %arg9[%c9, %c8_25, %c0_26], %88 {strides = array<i32>} : memref<10x32x32xf32, #tpu.memory_space<vmem>>, vector<1x16x32xf32>,
    } else {
    }
    %c0_9 = arith.constant 0 : index
    %c0_10 = arith.constant 0 : index
    %c0_11 = arith.constant 0 : index
    %11 = vector.load %arg9[%c0_9, %c0_10, %c0_11] : memref<10x32x32xf32, #tpu.memory_space<vmem>>, vector<10x32x32xf32>
    %12 = vector.extract_strided_slice %11 {offsets = [0, 7, 0], sizes = [10, 16, 32], strides = [1, 1, 1]} : vector<10x32x32xf32> to vector<10x16x32xf32>
    %13 = vector.extract_strided_slice %11 {offsets = [0, 8, 0], sizes = [10, 16, 32], strides = [1, 1, 1]} : vector<10x32x32xf32> to vector<10x16x32xf32>
    %14 = vector.extract_strided_slice %11 {offsets = [0, 9, 0], sizes = [10, 16, 32], strides = [1, 1, 1]} : vector<10x32x32xf32> to vector<10x16x32xf32>
    %c0_12 = arith.constant 0 : index
    %c0_13 = arith.constant 0 : index
    %c0_14 = arith.constant 0 : index
    %15 = vector.load %arg6[%c0_12, %c0_13, %c0_14] : memref<3x3x32xf32, #tpu.memory_space<vmem>>, vector<3x3x32xf32>
    %c0_15 = arith.constant 0 : index
    %c0_16 = arith.constant 0 : index
    %16 = vector.load %arg7[%c0_15, %c0_16] : memref<1x32xf32, #tpu.memory_space<vmem>>, vector<1x32xf32>
    %17 = vector.shape_cast %16 : vector<1x32xf32> to vector<32xf32>
    %18 = vector.shape_cast %17 : vector<32xf32> to vector<1x1x32xf32>
    %19 = vector.shape_cast %18 : vector<1x1x32xf32> to vector<1x1x32xf32>
    %20 = vector.broadcast %19 : vector<1x1x32xf32> to vector<8x16x32xf32>
    %21 = vector.extract_strided_slice %12 {offsets = [0, 0, 0], sizes = [8, 16, 32], strides = [1, 1, 1]} : vector<10x16x32xf32> to vector<8x16x32xf32>
    %22 = vector.extract_strided_slice %15 {offsets = [0, 0, 0], sizes = [1, 1, 32], strides = [1, 1, 1]} : vector<3x3x32xf32> to vector<1x1x32xf32>
    %23 = vector.shape_cast %22 : vector<1x1x32xf32> to vector<32xf32>
    %24 = vector.shape_cast %23 : vector<32xf32> to vector<1x1x32xf32>
    %25 = vector.broadcast %24 : vector<1x1x32xf32> to vector<8x16x32xf32>
    %26 = arith.mulf %21, %25 : vector<8x16x32xf32>
    %27 = arith.addf %20, %26 : vector<8x16x32xf32>
    %28 = vector.extract_strided_slice %13 {offsets = [0, 0, 0], sizes = [8, 16, 32], strides = [1, 1, 1]} : vector<10x16x32xf32> to vector<8x16x32xf32>
    %29 = vector.extract_strided_slice %15 {offsets = [0, 1, 0], sizes = [1, 1, 32], strides = [1, 1, 1]} : vector<3x3x32xf32> to vector<1x1x32xf32>
    %30 = vector.shape_cast %29 : vector<1x1x32xf32> to vector<32xf32>
    %31 = vector.shape_cast %30 : vector<32xf32> to vector<1x1x32xf32>
    %32 = vector.broadcast %31 : vector<1x1x32xf32> to vector<8x16x32xf32>
    %33 = arith.mulf %28, %32 : vector<8x16x32xf32>
    %34 = arith.addf %27, %33 : vector<8x16x32xf32>
    %35 = vector.extract_strided_slice %14 {offsets = [0, 0, 0], sizes = [8, 16, 32], strides = [1, 1, 1]} : vector<10x16x32xf32> to vector<8x16x32xf32>
    %36 = vector.extract_strided_slice %15 {offsets = [0, 2, 0], sizes = [1, 1, 32], strides = [1, 1, 1]} : vector<3x3x32xf32> to vector<1x1x32xf32>
    %37 = vector.shape_cast %36 : vector<1x1x32xf32> to vector<32xf32>
    %38 = vector.shape_cast %37 : vector<32xf32> to vector<1x1x32xf32>
    %39 = vector.broadcast %38 : vector<1x1x32xf32> to vector<8x16x32xf32>
    %40 = arith.mulf %35, %39 : vector<8x16x32xf32>
    %41 = arith.addf %34, %40 : vector<8x16x32xf32>
    %42 = vector.extract_strided_slice %12 {offsets = [1, 0, 0], sizes = [8, 16, 32], strides = [1, 1, 1]} : vector<10x16x32xf32> to vector<8x16x32xf32>
    %43 = vector.extract_strided_slice %15 {offsets = [1, 0, 0], sizes = [1, 1, 32], strides = [1, 1, 1]} : vector<3x3x32xf32> to vector<1x1x32xf32>
    %44 = vector.shape_cast %43 : vector<1x1x32xf32> to vector<32xf32>
    %45 = vector.shape_cast %44 : vector<32xf32> to vector<1x1x32xf32>
    %46 = vector.broadcast %45 : vector<1x1x32xf32> to vector<8x16x32xf32>
    %47 = arith.mulf %42, %46 : vector<8x16x32xf32>
    %48 = arith.addf %41, %47 : vector<8x16x32xf32>
    %49 = vector.extract_strided_slice %13 {offsets = [1, 0, 0], sizes = [8, 16, 32], strides = [1, 1, 1]} : vector<10x16x32xf32> to vector<8x16x32xf32>
    %50 = vector.extract_strided_slice %15 {offsets = [1, 1, 0], sizes = [1, 1, 32], strides = [1, 1, 1]} : vector<3x3x32xf32> to vector<1x1x32xf32>
    %51 = vector.shape_cast %50 : vector<1x1x32xf32> to vector<32xf32>
    %52 = vector.shape_cast %51 : vector<32xf32> to vector<1x1x32xf32>
    %53 = vector.broadcast %52 : vector<1x1x32xf32> to vector<8x16x32xf32>
    %54 = arith.mulf %49, %53 : vector<8x16x32xf32>
    %55 = arith.addf %48, %54 : vector<8x16x32xf32>
    %56 = vector.extract_strided_slice %14 {offsets = [1, 0, 0], sizes = [8, 16, 32], strides = [1, 1, 1]} : vector<10x16x32xf32> to vector<8x16x32xf32>
    %57 = vector.extract_strided_slice %15 {offsets = [1, 2, 0], sizes = [1, 1, 32], strides = [1, 1, 1]} : vector<3x3x32xf32> to vector<1x1x32xf32>
    %58 = vector.shape_cast %57 : vector<1x1x32xf32> to vector<32xf32>
    %59 = vector.shape_cast %58 : vector<32xf32> to vector<1x1x32xf32>
    %60 = vector.broadcast %59 : vector<1x1x32xf32> to vector<8x16x32xf32>
    %61 = arith.mulf %56, %60 : vector<8x16x32xf32>
    %62 = arith.addf %55, %61 : vector<8x16x32xf32>
    %63 = vector.extract_strided_slice %12 {offsets = [2, 0, 0], sizes = [8, 16, 32], strides = [1, 1, 1]} : vector<10x16x32xf32> to vector<8x16x32xf32>
    %64 = vector.extract_strided_slice %15 {offsets = [2, 0, 0], sizes = [1, 1, 32], strides = [1, 1, 1]} : vector<3x3x32xf32> to vector<1x1x32xf32>
    %65 = vector.shape_cast %64 : vector<1x1x32xf32> to vector<32xf32>
    %66 = vector.shape_cast %65 : vector<32xf32> to vector<1x1x32xf32>
    %67 = vector.broadcast %66 : vector<1x1x32xf32> to vector<8x16x32xf32>
    %68 = arith.mulf %63, %67 : vector<8x16x32xf32>
    %69 = arith.addf %62, %68 : vector<8x16x32xf32>
    %70 = vector.extract_strided_slice %13 {offsets = [2, 0, 0], sizes = [8, 16, 32], strides = [1, 1, 1]} : vector<10x16x32xf32> to vector<8x16x32xf32>
    %71 = vector.extract_strided_slice %15 {offsets = [2, 1, 0], sizes = [1, 1, 32], strides = [1, 1, 1]} : vector<3x3x32xf32> to vector<1x1x32xf32>
    %72 = vector.shape_cast %71 : vector<1x1x32xf32> to vector<32xf32>
    %73 = vector.shape_cast %72 : vector<32xf32> to vector<1x1x32xf32>
    %74 = vector.broadcast %73 : vector<1x1x32xf32> to vector<8x16x32xf32>
    %75 = arith.mulf %70, %74 : vector<8x16x32xf32>
    %76 = arith.addf %69, %75 : vector<8x16x32xf32>
    %77 = vector.extract_strided_slice %14 {offsets = [2, 0, 0], sizes = [8, 16, 32], strides = [1, 1, 1]} : vector<10x16x32xf32> to vector<8x16x32xf32>
    %78 = vector.extract_strided_slice %15 {offsets = [2, 2, 0], sizes = [1, 1, 32], strides = [1, 1, 1]} : vector<3x3x32xf32> to vector<1x1x32xf32>
    %79 = vector.shape_cast %78 : vector<1x1x32xf32> to vector<32xf32>
    %80 = vector.shape_cast %79 : vector<32xf32> to vector<1x1x32xf32>
    %81 = vector.broadcast %80 : vector<1x1x32xf32> to vector<8x16x32xf32>
    %82 = arith.mulf %77, %81 : vector<8x16x32xf32>
    %83 = arith.addf %76, %82 : vector<8x16x32xf32>
    %c0_17 = arith.constant 0 : index
    %c0_18 = arith.constant 0 : index
    %c0_19 = arith.constant 0 : index
    %c0_20 = arith.constant 0 : index
    %84 = vector.load %arg8[%c0_17, %c0_18, %c0_19, %c0_20] : memref<1x8x16x32xf32, #tpu.memory_space<vmem>>, vector<1x8x16x32xf32>
    %85 = vector.shape_cast %84 : vector<1x8x16x32xf32> to vector<8x16x32xf32>
    %86 = vector.shape_cast %83 : vector<8x16x32xf32> to vector<1x8x16x32xf32>
    tpu.vector_store %arg8[%c0_17, %c0_18, %c0_19, %c0_20], %86 {strides = array<i32>} : memref<1x8x16x32xf32, #tpu.memory_space<vmem>>, vector<1x8x16x32xf32>,
    return
  }
  func.func @transform_0(%arg0: i32, %arg1: i32, %arg2: i32) -> (i32, i32, i32, i32) {
    %c0_i32 = arith.constant 0 : i32
    %c0_i32_0 = arith.constant 0 : i32
    return %arg0, %arg2, %c0_i32, %arg1 : i32, i32, i32, i32
  }
  func.func @transform_1(%arg0: i32, %arg1: i32, %arg2: i32) -> (i32, i32, i32, i32) {
    %c8_i32 = arith.constant 8 : i32
    %0 = arith.muli %arg2, %c8_i32 : i32
    %c1_i32 = arith.constant 1 : i32
    %1 = arith.subi %0, %c1_i32 : i32
    %c0_i32 = arith.constant 0 : i32
    %2 = arith.maxsi %1, %c0_i32 : i32
    %c0_i32_0 = arith.constant 0 : i32
    %c0_i32_1 = arith.constant 0 : i32
    return %arg0, %2, %c0_i32_0, %arg1 : i32, i32, i32, i32
  }
  func.func @transform_2(%arg0: i32, %arg1: i32, %arg2: i32) -> (i32, i32, i32, i32) {
    %c1_i32 = arith.constant 1 : i32
    %0 = arith.addi %arg2, %c1_i32 : i32
    %c8_i32 = arith.constant 8 : i32
    %1 = arith.muli %0, %c8_i32 : i32
    %c15_i32 = arith.constant 15 : i32
    %2 = arith.minsi %1, %c15_i32 : i32
    %c0_i32 = arith.constant 0 : i32
    %c0_i32_0 = arith.constant 0 : i32
    return %arg0, %2, %c0_i32, %arg1 : i32, i32, i32, i32
  }
  func.func @transform_3(%arg0: i32, %arg1: i32, %arg2: i32) -> (i32, i32, i32) {
    %c0_i32 = arith.constant 0 : i32
    %c0_i32_0 = arith.constant 0 : i32
    %c0_i32_1 = arith.constant 0 : i32
    return %c0_i32, %c0_i32_0, %arg1 : i32, i32, i32
  }
  func.func @transform_4(%arg0: i32, %arg1: i32, %arg2: i32) -> (i32, i32) {
    %c0_i32 = arith.constant 0 : i32
    %c0_i32_0 = arith.constant 0 : i32
    return %c0_i32, %arg1 : i32, i32
  }
  func.func @transform_5(%arg0: i32, %arg1: i32, %arg2: i32) -> (i32, i32, i32, i32) {
    %c0_i32 = arith.constant 0 : i32
    %c0_i32_0 = arith.constant 0 : i32
    return %arg0, %arg2, %c0_i32, %arg1 : i32, i32, i32, i32
  }
}

</mosaic_0001>

<bundles_post_ra>
// kernel: tpu_custom_call.1
= control target key start
LH: loop header
LB: loop body
LE: loop exit
PB: predicated region body
PF: predicated region fallthrough
CT: control target
= control target key end

     0   :  { %s3363_s0 = inlined_call_operand.hbm [shape: f32[2,16,16,32], index: 0, kind: input, shape index: {}]   ;;  %s3364_s1 = inlined_call_operand.hbm [shape: f32[2,16,16,32], index: 1, kind: input, shape index: {}]   ;;  %s3365_s2 = inlined_call_operand.hbm [shape: f32[2,16,16,32], index: 2, kind: input, shape index: {}]   ;;  %s3366_s3 = inlined_call_operand.hbm [shape: f32[3,3,32], index: 3, kind: input, shape index: {}]   ;;  %s3367_s4 = inlined_call_operand.vmem [shape: f32[1,32], index: 4, kind: input, shape index: {}]   ;;  %s3368_s5 = inlined_call_operand.hbm [shape: f32[2,16,16,32], index: 5, kind: output, shape index: {}]  }
   0x1   :  { %3391 = sst [smem:[#allocation32_spill]] %s3363_s0 }
   0x2   :  { %3392 = sst [smem:[#allocation33_spill]] %s3364_s1 }
   0x3   :  { %3393 = sst [smem:[#allocation34_spill]] %s3365_s2 }
   0x4   :  { %3394 = sst [smem:[#allocation35_spill]] %s3366_s3 }
   0x5   :  { %3395 = sst [smem:[#allocation36_spill]] %s3367_s4 }
   0x6   :  { %3396 = sst [smem:[#allocation37_spill]] %s3368_s5 }
   0x7   :  { %10 = vsyncpa [#allocation4], 0 }
   0x8   :  { %12 = vsyncpa [#allocation4 + $0x1], 0 }
   0x9   :  { %13 = vsyncpa [#allocation7], 0 }
   0xa   :  { %15 = vsyncpa [#allocation7 + $0x1], 0 }
   0xb   :  { %16 = vsyncpa [#allocation10], 0 }
   0xc   :  { %17 = vsyncpa [#allocation5], 0 }
   0xd   :  { %19 = vsyncpa [#allocation5 + $0x1], 0  ;;  %s2209_s18 = smov 0   ;;  %s2211_s19 = smov 0  }
   0xe   :  { %s2213_s20 = smov 0   ;;  %s2215_s21 = smov 0  }
   0xf   :  { %s2217_s22 = smov 0   ;;  %s2219_s23 = smov 0  }
  0x10   :  { %s2221_s24 = smov 0   ;;  %s2223_s25 = smov 0  }
  0x11   :  { %s2225_s26 = smov 0   ;;  %s2227_s27 = smov 0  }
  0x12   :  { %s2229_s28 = smov 0   ;;  %s2231_s29 = smov 0  }
  0x13   :  { %s2233_s30 = smov 0   ;;  %s2235_s6 = smov 0  }
  0x14 LB: > { %3397 = sst [smem:[#allocation17_spill]] %s2113_s18  ;;  %s37_s7 = sadd.s32 1, %s2157_s29  ;;  %s2165_s6 = sphi %s2235_s6, %s25_s6   ;;  %s2161_s30 = sphi %s2233_s30, %s3465_s30   ;;  %s2157_s29 = sphi %s2231_s29, %s3464_s29   ;;  %s2153_s28 = sphi %s2229_s28, %s3463_s28   ;;  %s2149_s27 = sphi %s2227_s27, %s3462_s27   ;;  %s2145_s26 = sphi %s2225_s26, %s3461_s26   ;;  %s2141_s25 = sphi %s2223_s25, %s3469_s25   ;;  %s2137_s24 = sphi %s2221_s24, %s3468_s24   ;;  %s2133_s23 = sphi %s2219_s23, %s3459_s23   ;;  %s2129_s22 = sphi %s2217_s22, %s3467_s22   ;;  %s2125_s21 = sphi %s2215_s21, %s3466_s21   ;;  %s2121_s20 = sphi %s2213_s20, %s3485_s20   ;;  %s2117_s19 = sphi %s2211_s19, %s3457_s19   ;;  %s2113_s18 = sphi %s2209_s18, %s3456_s18  }
  0x15   : > { %3398 = sst [smem:[#allocation18_spill]] %s2117_s19  ;;  %s44_s8 = sadd.s32 1, %s2161_s30 }
  0x16   : > { %3399 = sst [smem:[#allocation19_spill]] %s2121_s20  ;;  %p38_p0 = scmp.ge.s32.totalorder %s37_s7, 2 }
  0x17   : > { %3400 = sst [smem:[#allocation20_spill]] %s2133_s23  ;;  %p3379_p1 = scmp.eq.s32.totalorder %s2165_s6, 0 }
  0x18   : > { %3401 = sst [smem:[#allocation21_spill]] %s2145_s26  ;;  %s1694_s9 = sshll.u32 %s2157_s29, 3 }
  0x19   : > { %3402 = sst [smem:[#allocation22_spill]] %s2149_s27  ;;  %s93_s10 = sadd.s32 1, %s2133_s23 }
  0x1a   : > { %3403 = sst [smem:[#allocation23_spill]] %s2153_s28  ;;  %s3471_s7 = smov (%p38_p0, %s37_s7), 0 }
  0x1b   : > { %3404 = sst [smem:[#allocation24_spill]] %s2157_s29  ;;  %s3473_s8 = smov (!%p38_p0, %s44_s8), %s2161_s30 }
  0x1c   : > { %3405 = sst [smem:[#allocation25_spill]] %s2161_s30  ;;  %s49_s11 = ssub.s32 %s2157_s29, %s3471_s7 }
  0x1d   : > { %3406 = sst [smem:[#allocation26_spill]] %s3471_s7  ;;  %s1695_s12 = sadd.s32 4294967295, %s1694_s9 }
  0x1e   : > { %p46_p2 = scmp.ge.s32.totalorder %s3473_s8, 2  ;;  %p80_p3 = scmp.gt.s32.totalorder %s1695_s12, 0 }
  0x1f   : > { %s1696_s13 = sshll.u32 %s3471_s7, 3  ;;  %p100_p4 = scmp.ne.s32.totalorder %s2133_s23, %s2129_s22 }
  0x20   : > { %s3475_s8 = smov (%p46_p2, %s3473_s8), 0  ;;  %s3477_s12 = smov (!%p80_p3, %s1695_s12), 0 }
  0x21   : > { %3407 = sst [smem:[#allocation27_spill]] %s3475_s8  ;;  %s2296_s14 = ssub.s32 %s2161_s30, %s3475_s8 }
  0x22   : > { %3408 = sst [smem:[#allocation28_spill]] %s2296_s14  ;;  %s1697_s15 = sadd.s32 4294967295, %s1696_s13 }
  0x23   : > { %s2299_s16 = sor.u32 %s49_s11, %s2296_s14  ;;  %p84_p5 = scmp.gt.s32.totalorder %s1697_s15, 0 }
  0x24   : > { %p2304_p7 = por %p100_p4, %p3379_p1  ;;  %p106_p8 = scmp.ne.s32.totalorder %s2129_s22, %s2125_s21 }
  0x25   : > { %s3479_s15 = smov (!%p84_p5, %s1697_s15), 0  ;;  %s2310_s8 = sadd.s32 8, %s1694_s9 }
  0x26   : > { %3410 = sst [smem:[#allocation29_spill]] %s2310_s8  ;;  %s87_s7 = ssub.s32 %s3477_s12, %s3479_s15 }
  0x27   : > { %s88_s5 = sor.u32 %s87_s7, %s2296_s14  ;;  %s2314_s11 = sadd.s32 8, %s1696_s13 }
  0x28   : > { %p91_p10 = scmp.eq.s32.totalorder %s88_s5, 0  ;;  %p3378_p12 = scmp.lt.s32.totalorder %s2165_s6, 4 }
  0x29   : > { %s2322_s4 = sshll.u32 %s2161_s30, 5  ;;  %s296_s27 = sand.u32 1, %s2165_s6  }
  0x2a   : > { %s2319_s28 = scalar_select %p91_p10, %s2133_s23, %s93_s10  }
  0x2b   : > { %s298_s9 = sand.u32 1, %s2133_s23   ;;  %s1712_s18 = sshll.u32 %s3477_s12, 1 }
  0x2c   : > { %3411 = sst [smem:[#allocation30_spill]] %s2319_s28  ;;  %s1709_s2 = sshll.u32 %s298_s9, 4 }
  0x2d   : > { %s311_s15 = sadd.s32 %s1712_s18, %s2322_s4  ;;  %s300_s7 = scalar_lea.vmem [#allocation6], %s1709_s2 }
  0x2e   : > { %s1714_s19 = sshll.u32 %s311_s15, 7  ;;  %s314_s13 = sshll.u32 %s300_s7, 4  ;;  %s315_s13 = int_to_ptr.vmem [resolvable:$true] %s314_s13 }
  0x2f   : > { %s3412_s1 = sld [smem:[#allocation33_spill]]  ;;  %p2334_p13 = pnand %p3378_p12, %p2304_p7 }
  0x30   : > { %s2338_s10 = scalar_lea.sflag [#allocation7], %s296_s27  ;;  %s1912_s18 = scalar_lea.vmem %s315_s13, 256 }
  0x31   : > { %p1901_p0 = pneg %p2334_p13  ;;  %p1913_p2 = scmp.ne.s32.totalorder %s315_s13, %s1912_s18 }
  0x32   : > { %s2167_s2 = smov [#allocation6]  }
  0x33   : > { %p1915_p3 = pnand %p1913_p2, %p1901_p0  ;;  %s1917_s12 = sshll.u32 %s2167_s2, 4  ;;  %s1918_s12 = int_to_ptr.vmem [resolvable:$false] %s1917_s12 }
  0x34   : > { %p1920_p5 = scmp.lt.s32.totalorder %s315_s13, %s1918_s12 }
  0x35   : > { %s313_s20 = scalar_lea.hbm %s3412_s1, %s1714_s19  ;;  %p1916_p4 = pneg %p1915_p3 }
  0x36   : > { %s1919_s19 = scalar_lea.vmem %s1918_s12, 512 }
  0x37   : > { %p1921_p10 = scmp.lt.s32.totalorder %s1919_s19, %s1912_s18 }
  0x39   : > { %p1922_p11 = por %p1921_p10, %p1920_p5 }
  0x3b   : > { %p1923_p7 = pnand %p1922_p11, %p1916_p4 }
  0x3d   : > { %1926 = shalt.err (!%p1923_p7)
}
  0x3e   : > { %s3380_s8 = smov 128   ;;  %s3382_s27 = smov 8  }
  0x3f   : > { %1766 = dma.hbm_to_vmem [thread:$0]  (!%p2334_p13), %s313_s20, 256, %s315_s13, %s2338_s10, %s3380_s8, %s3380_s8, %s3382_s27  }
  0x40   : > { %s2349_s14 = sadd.s32 4294967295, %s2165_s6   ;;  %p1700_p11 = scmp.ge.s32.totalorder %s2165_s6, 1 }
  0x41   : > { %p3385_p0 = scmp.eq.s32.totalorder %s2349_s14, 0  ;;  %p237_p3 = scmp.lt.s32.totalorder %s2165_s6, 5 }
  0x42   : > { %s2170_s20 = smov [#allocation9]  }
  0x43   : > { %p2360_p4 = por %p106_p8, %p3385_p0  ;;  %p2364_p5 = pnand %p1700_p11, %p237_p3 }
  0x44   : > { %s251_s15 = sshll.u32 %s2170_s20, 4  ;;  %s252_s15 = int_to_ptr.vmem [resolvable:$true] %s251_s15 }
  0x45   : > { %p1756_p13 = pneg %p2364_p5  ;;  %s1938_s7 = scalar_lea.vmem %s252_s15, 192 }
  0x46   : > { %p1939_p9 = scmp.ne.s32.totalorder %s252_s15, %s1938_s7  ;;  %p1946_p2 = scmp.lt.s32.totalorder %s252_s15, %s252_s15 }
  0x47   : > { %p1757_p10 = pnand %p1756_p13, %p3385_p0  ;;  %p1947_p1 = scmp.lt.s32.totalorder %s1938_s7, %s1938_s7 }
  0x49   : > { %p1929_p7 = pneg %p1757_p10  ;;  %p1948_p6 = por %p1947_p1, %p1946_p2 }
  0x4b   : > { %p1941_p12 = pnand %p1939_p9, %p1929_p7 }
  0x4d   : > { %p1942_p8 = pneg %p1941_p12 }
  0x4f   : > { %p1949_p11 = pnand %p1948_p6, %p1942_p8 }
  0x51   : > { %1952 = shalt.err (!%p1949_p11)
}
  0x52   : > { %s2171_s21 = smov 64   ;;  %s2172_s13 = smov 4  }
  0x53   : > { %s3416_s3 = sld [smem:[#allocation35_spill]]  ;;  %s1693_s2 = sadd.s32 4294967294, %s2165_s6  }
  0x54   : > { %s55_s12 = sadd.s32 1, %s2145_s26  ;;  %p3417_p1 = scmp.eq.s32.totalorder %s2299_s16, 0 }
  0x55   : > { %p62_p6 = scmp.ne.s32.totalorder %s2145_s26, %s2141_s25  ;;  %p68_p9 = scmp.ne.s32.totalorder %s2141_s25, %s2137_s24 }
  0x56   : > { %s2380_s19 = scalar_select %p3417_p1, %s2145_s26, %s55_s12  }
  0x57   : > { %p230_p12 = scmp.eq.s32.totalorder %s1693_s2, 3  ;;  %s271_s20 = sand.u32 1, %s2145_s26  }
  0x58   : > { %3418 = sst [smem:[#allocation31_spill]] %s2380_s19  ;;  %p3419_p2 = scmp.eq.s32.totalorder %s2165_s6, 0 }
  0x59   : > { %1759 = dma.hbm_to_vmem [thread:$0]  (!%p1757_p10), %s3416_s3, 192, %s252_s15, [#allocation10], %s2171_s21, %s2171_s21, %s2172_s13  }
  0x5a   : > { %p64_p3 = por %p3419_p2, %p62_p6  ;;  %p2391_p13 = por %p3385_p0, %p68_p9 }
  0x5b   : > { %p3421_p7 = scmp.eq.s32.totalorder %s2349_s14, 3  ;;  %p2401_p10 = por %p230_p12, %p68_p9 }
  0x5c   : > { %s1704_s21 = sshll.u32 %s271_s20, 7  ;;  %s1740_s13 = sshll.u32 %s2157_s29, 4 }
  0x5d   : > { %p2397_p8 = por %p3421_p7, %p62_p6  ;;  %s283_s5 = sadd.s32 %s1740_s13, %s2322_s4 }
  0x5e   : > { %s3423_s16 = scalar_select %p2401_p10, 1, 0 }
  0x5f   : > { %s3422_s15 = scalar_select %p2397_p8, 1, 0 }
  0x60   : > { %s275_s18 = scalar_lea.vmem [#allocation3], %s1704_s21  ;;  %s1708_s12 = sshll.u32 %s283_s5, 7 }
  0x61   : > { %s286_s2 = sshll.u32 %s275_s18, 4  ;;  %s3424_s0 = sld [smem:[#allocation32_spill]]  ;;  %s287_s2 = int_to_ptr.vmem [resolvable:$true] %s286_s2 }
  0x62   : > { %p3425_p11 = scmp.lt.s32.totalorder %s2165_s6, 4  ;;  %s272_s30 = scalar_lea.sflag [#allocation4], %s271_s20 }
  0x63   : > { %s1966_s19 = scalar_lea.vmem %s287_s2, 2048  ;;  %s2173_s21 = smov [#allocation3]  }
  0x64   : > { %p2412_p1 = pnand %p3425_p11, %p64_p3  ;;  %p1967_p9 = scmp.ne.s32.totalorder %s287_s2, %s1966_s19 }
  0x65   : > { %s1971_s13 = sshll.u32 %s2173_s21, 4  ;;  %s1972_s13 = int_to_ptr.vmem [resolvable:$false] %s1971_s13 }
  0x66   : > { %p1955_p6 = pneg %p2412_p1  ;;  %s1973_s5 = scalar_lea.vmem %s1972_s13, 4096 }
  0x67   : > { %s285_s1 = scalar_lea.hbm %s3424_s0, %s1708_s12  ;;  %p1974_p7 = scmp.lt.s32.totalorder %s287_s2, %s1972_s13 }
  0x68   : > { %p1969_p12 = pnand %p1967_p9, %p1955_p6  ;;  %p1975_p0 = scmp.lt.s32.totalorder %s1973_s5, %s1966_s19 }
  0x6a   : > { %p1970_p2 = pneg %p1969_p12  ;;  %p1976_p10 = por %p1975_p0, %p1974_p7 }
  0x6c   : > { %p1977_p8 = pnand %p1976_p10, %p1970_p2 }
  0x6e   : > { %1980 = shalt.err (!%p1977_p8)
}
  0x6f   : > { %s3427_s8 = smov 8   ;;  %s3428_s27 = smov 128  }
  0x70   : > { %s3429_s20 = sld [smem:[#allocation19_spill]]  ;;  %p3435_p3 = scmp.lt.s32.totalorder %s2314_s11, 15 }
  0x71   : > { %s3430_s18 = sld [smem:[#allocation29_spill]]  ;;  %p3436_p11 = scmp.eq.s32.totalorder %s2165_s6, 0 }
  0x72   : > { %s3431_s12 = sld [smem:[#allocation18_spill]]  ;;  %s3483_s11 = smov (!%p3435_p3, %s2314_s11), 15 }
  0x73   : > { %s3432_s21 = sld [smem:[#allocation17_spill]]  ;;  %p3437_p12 = scmp.eq.s32.totalorder %s2349_s14, 0 }
  0x74   : > { %s3433_s13 = sld [smem:[#allocation28_spill]] }
  0x75   : > { %1763 = dma.hbm_to_vmem [thread:$0]  (!%p2412_p1), %s285_s1, 2048, %s287_s2, %s272_s30, %s3428_s27, %s3428_s27, %s3427_s8  }
  0x76   : > { %s131_s3 = sadd.s32 1, %s3429_s20  ;;  %s326_s5 = sand.u32 1, %s3429_s20  }
  0x77   : > { %p3434_p0 = scmp.lt.s32.totalorder %s3430_s18, 15  ;;  %s1715_s1 = sshll.u32 %s326_s5, 4 }
  0x78   : > { %p138_p8 = scmp.ne.s32.totalorder %s3429_s20, %s3431_s12  ;;  %s328_s28 = scalar_lea.vmem [#allocation8], %s1715_s1 }
  0x79   : > { %s3481_s18 = smov (!%p3434_p0, %s3430_s18), 15  ;;  %p144_p10 = scmp.ne.s32.totalorder %s3431_s12, %s3432_s21 }
  0x7a   : > { %s125_s19 = ssub.s32 %s3481_s18, %s3483_s11  ;;  %p140_p6 = por %p138_p8, %p3436_p11 }
  0x7b   : > { %s126_s0 = sor.u32 %s125_s19, %s3433_s13  ;;  %p2440_p2 = por %p144_p10, %p3437_p12 }
  0x7c   : > { %p129_p9 = scmp.eq.s32.totalorder %s126_s0, 0  ;;  %s1717_s30 = sshll.u32 %s3481_s18, 1 }
  0x7d   : > { %s3438_s29 = scalar_select %p2440_p2, 1, 0 }
  0x7e   : > { %s3485_s20 = smov (!%p129_p9, %s3429_s20), %s131_s3  ;;  %s339_s2 = sadd.s32 %s1717_s30, %s2322_s4 }
  0x7f   : > { %s1719_s26 = sshll.u32 %s339_s2, 7  ;;  %s342_s12 = sshll.u32 %s328_s28, 4  ;;  %s343_s12 = int_to_ptr.vmem [resolvable:$true] %s342_s12 }
  0x80   : > { %s3439_s23 = sld [smem:[#allocation34_spill]]  ;;  %p3440_p1 = scmp.lt.s32.totalorder %s2165_s6, 4 }
  0x81   : > { %s1994_s18 = scalar_lea.vmem %s343_s12, 256  ;;  %s2174_s4 = smov [#allocation8]  }
  0x82   : > { %p2453_p7 = pnand %p3440_p1, %p140_p6  ;;  %p1995_p3 = scmp.ne.s32.totalorder %s343_s12, %s1994_s18 }
  0x83   : > { %s1999_s3 = sshll.u32 %s2174_s4, 4  ;;  %s2000_s3 = int_to_ptr.vmem [resolvable:$false] %s1999_s3 }
  0x84   : > { %p1983_p0 = pneg %p2453_p7  ;;  %s2001_s28 = scalar_lea.vmem %s2000_s3, 512 }
  0x85   : > { %p2002_p11 = scmp.lt.s32.totalorder %s343_s12, %s2000_s3  ;;  %p2003_p9 = scmp.lt.s32.totalorder %s2001_s28, %s1994_s18 }
  0x86   : > { %s341_s13 = scalar_lea.hbm %s3439_s23, %s1719_s26  ;;  %p1997_p8 = pnand %p1995_p3, %p1983_p0 }
  0x87   : > { %p2004_p12 = por %p2003_p9, %p2002_p11 }
  0x88   : > { %p1998_p10 = pneg %p1997_p8 }
  0x8a   : > { %p2005_p2 = pnand %p2004_p12, %p1998_p10 }
  0x8c   : > { %2008 = shalt.err (!%p2005_p2)
}
  0x8d   : > { %1769 = dma.hbm_to_vmem [thread:$0]  (!%p2453_p7), %s341_s13, 256, %s343_s12, %s2338_s10, %s3428_s27, %s3428_s27, %s3427_s8  }
  0x8e   : > { %354 = sbr.rel (%p2364_p5) target bundleno = 394 (0x18a), region = 40  ;;  %s2468_s23 = sand.u32 (!%p2364_p5), 1, %s2141_s25  }
  0x8f   : > { %s1721_s26 = sshll.u32 (!%p2364_p5), %s2468_s23, 7  ;;  %s357_s19 = scalar_lea.sflag (!%p2364_p5), [#allocation4], %s2468_s23 }
  0x90   : > { %s2474_s5 = scalar_lea.vmem (!%p2364_p5), [#allocation3], %s1721_s26 }
  0x93   : > { %2092 = dma.done.wait (%p2391_p13), %s357_s19, 2048  }
  0x94   : > { %2094 = vsyncadd (%p2391_p13), %s357_s19, 4294965248  ;;  %s365_s10 = sand.u32 1, %s2349_s14   ;;  %s367_s9 = sand.u32 1, %s2129_s22  }
  0x95   : > { %s2482_s8 = sshll.u32 %s367_s9, 4  ;;  %s366_s27 = scalar_lea.sflag [#allocation7], %s365_s10 }
  0x96   : > { %s369_s1 = scalar_lea.vmem [#allocation6], %s2482_s8 }
  0x97   : > { %2096 = dma.done.wait (%p2360_p4), %s366_s27, 256  }
  0x98   : > { %2098 = vsyncadd (%p2360_p4), %s366_s27, 4294967040  ;;  %s3442_s30 = sld [smem:[#allocation18_spill]]  ;;  %p3443_p5 = scmp.ne.s32.totalorder %s3438_s29, 0 }
  0x9e   : > { %s376_s2 = sand.u32 1, %s3442_s30  }
  0x9f   : > { %s2490_s7 = sshll.u32 %s376_s2, 4 }
  0xa0   : > { %s378_s12 = scalar_lea.vmem [#allocation8], %s2490_s7 }
  0xa1   : > { %2100 = dma.done.wait (%p3443_p5), %s366_s27, 256  }
  0xa2   : > { %2102 = vsyncadd (%p3443_p5), %s366_s27, 4294967040  ;;  %p3444_p13 = scmp.eq.s32.totalorder %s2349_s14, 0 }
  0xa4   : > { %2104 = dma.done.wait (%p3444_p13), [#allocation10], 192   ;;  %p3445_p6 = pmov %p3444_p13 }
  0xa5   : > { %vm435_vm0 = vcmask 261120   ;;  %v2175_v0 = vmov 0.0   ;;  %v476_v1 = vld [vmem:[%s2474_s5] sm:$0xff]  ;;  %v477_v2 = vld [vmem:[%s2474_s5 + $0x8] sm:$0xff]  ;;  %v478_v3 = vld [vmem:[%s2474_s5 + $0x10] sm:$0xff]  ;;  %s2575_s29 = scalar_lea.vmem [#allocation11], %s1721_s26 }
  0xa6   : > { %2106 = vsyncadd (%p3445_p6), [#allocation10], 4294967104  ;;  %441 = vst.msk [vmem:[#allocation2 + $0x28] sm:$0xff] %vm435_vm0, %v2175_v0  ;;  %v479_v4 = vld [vmem:[%s2474_s5 + $0x18] sm:$0xff]  ;;  %v480_v5 = vld [vmem:[%s2474_s5 + $0x20] sm:$0xff]  ;;  %s3446_s14 = sld [smem:[#allocation22_spill]] }
  0xa7   : > { %436 = vst.msk [vmem:[#allocation2] sm:$0xff] %vm435_vm0, %v2175_v0  ;;  %437 = vst.msk [vmem:[#allocation2 + $0x8] sm:$0xff] %vm435_vm0, %v2175_v0  ;;  %v481_v6 = vld [vmem:[%s2474_s5 + $0x28] sm:$0xff]  ;;  %v482_v7 = vld [vmem:[%s2474_s5 + $0x30] sm:$0xff] }
  0xa8   : > { %438 = vst.msk [vmem:[#allocation2 + $0x10] sm:$0xff] %vm435_vm0, %v2175_v0  ;;  %439 = vst.msk [vmem:[#allocation2 + $0x18] sm:$0xff] %vm435_vm0, %v2175_v0  ;;  %v483_v8 = vld [vmem:[%s2474_s5 + $0x38] sm:$0xff]  ;;  %v484_v9 = vld [vmem:[%s2474_s5 + $0x40] sm:$0xff] }
  0xa9   : > { %440 = vst.msk [vmem:[#allocation2 + $0x20] sm:$0xff] %vm435_vm0, %v2175_v0  ;;  %442 = vst.msk [vmem:[#allocation2 + $0x30] sm:$0xff] %vm435_vm0, %v2175_v0  ;;  %v485_v10 = vld [vmem:[%s2474_s5 + $0x48] sm:$0xff]  ;;  %v486_v11 = vld [vmem:[%s2474_s5 + $0x50] sm:$0xff] }
  0xaa   : > { %443 = vst.msk [vmem:[#allocation2 + $0x38] sm:$0xff] %vm435_vm0, %v2175_v0  ;;  %444 = vst.msk [vmem:[#allocation2 + $0x40] sm:$0xff] %vm435_vm0, %v2175_v0  ;;  %v487_v12 = vld [vmem:[%s2474_s5 + $0x58] sm:$0xff]  ;;  %v488_v13 = vld [vmem:[%s2474_s5 + $0x60] sm:$0xff] }
  0xab   : > { %445 = vst.msk [vmem:[#allocation2 + $0x48] sm:$0xff] %vm435_vm0, %v2175_v0  ;;  %446 = vst.msk [vmem:[#allocation2 + $0x50] sm:$0xff] %vm435_vm0, %v2175_v0  ;;  %v489_v14 = vld [vmem:[%s2474_s5 + $0x68] sm:$0xff]  ;;  %v490_v15 = vld [vmem:[%s2474_s5 + $0x70] sm:$0xff] }
  0xac   : > { %447 = vst.msk [vmem:[#allocation2 + $0x58] sm:$0xff] %vm435_vm0, %v2175_v0  ;;  %448 = vst.msk [vmem:[#allocation2 + $0x60] sm:$0xff] %vm435_vm0, %v2175_v0  ;;  %v491_v16 = vld [vmem:[%s2474_s5 + $0x78] sm:$0xff]  ;;  %p1726_p4 = scmp.le.s32.totalorder %s3446_s14, 0 }
  0xad   : > { %449 = vst.msk [vmem:[#allocation2 + $0x68] sm:$0xff] %vm435_vm0, %v2175_v0  ;;  %450 = vst.msk [vmem:[#allocation2 + $0x70] sm:$0xff] %vm435_vm0, %v2175_v0 }
  0xae   : > { %451 = vst.msk [vmem:[#allocation2 + $0x78] sm:$0xff] %vm435_vm0, %v2175_v0  ;;  %452 = vst.msk [vmem:[#allocation2 + $0x80] sm:$0xff] %vm435_vm0, %v2175_v0 }
  0xaf   : > { %453 = vst.msk [vmem:[#allocation2 + $0x88] sm:$0xff] %vm435_vm0, %v2175_v0  ;;  %454 = vst.msk [vmem:[#allocation2 + $0x90] sm:$0xff] %vm435_vm0, %v2175_v0 }
  0xb0   : > { %455 = vst.msk [vmem:[#allocation2 + $0x98] sm:$0xff] %vm435_vm0, %v2175_v0  ;;  %456 = vst.msk [vmem:[#allocation2 + $0xa0] sm:$0xff] %vm435_vm0, %v2175_v0 }
  0xb1   : > { %457 = vst.msk [vmem:[#allocation2 + $0xa8] sm:$0xff] %vm435_vm0, %v2175_v0  ;;  %458 = vst.msk [vmem:[#allocation2 + $0xb0] sm:$0xff] %vm435_vm0, %v2175_v0 }
  0xb2   : > { %459 = vst.msk [vmem:[#allocation2 + $0xb8] sm:$0xff] %vm435_vm0, %v2175_v0  ;;  %460 = vst.msk [vmem:[#allocation2 + $0xc0] sm:$0xff] %vm435_vm0, %v2175_v0 }
  0xb3   : > { %461 = vst.msk [vmem:[#allocation2 + $0xc8] sm:$0xff] %vm435_vm0, %v2175_v0  ;;  %462 = vst.msk [vmem:[#allocation2 + $0xd0] sm:$0xff] %vm435_vm0, %v2175_v0 }
  0xb4   : > { %463 = vst.msk [vmem:[#allocation2 + $0xd8] sm:$0xff] %vm435_vm0, %v2175_v0  ;;  %464 = vst.msk [vmem:[#allocation2 + $0xe0] sm:$0xff] %vm435_vm0, %v2175_v0 }
  0xb5   : > { %465 = vst.msk [vmem:[#allocation2 + $0xe8] sm:$0xff] %vm435_vm0, %v2175_v0  ;;  %466 = vst.msk [vmem:[#allocation2 + $0xf0] sm:$0xff] %vm435_vm0, %v2175_v0 }
  0xb6   : > { %467 = vst.msk [vmem:[#allocation2 + $0xf8] sm:$0xff] %vm435_vm0, %v2175_v0  ;;  %468 = vst.msk [vmem:[#allocation2 + $0x100] sm:$0xff] %vm435_vm0, %v2175_v0 }
  0xb7   : > { %469 = vst.msk [vmem:[#allocation2 + $0x108] sm:$0xff] %vm435_vm0, %v2175_v0  ;;  %470 = vst.msk [vmem:[#allocation2 + $0x110] sm:$0xff] %vm435_vm0, %v2175_v0 }
  0xb8   : > { %471 = vst.msk [vmem:[#allocation2 + $0x118] sm:$0xff] %vm435_vm0, %v2175_v0  ;;  %472 = vst.msk [vmem:[#allocation2 + $0x120] sm:$0xff] %vm435_vm0, %v2175_v0 }
  0xb9   : > { %473 = vst.msk [vmem:[#allocation2 + $0x128] sm:$0xff] %vm435_vm0, %v2175_v0  ;;  %474 = vst.msk [vmem:[#allocation2 + $0x130] sm:$0xff] %vm435_vm0, %v2175_v0 }
  0xba   : > { %475 = vst.msk [vmem:[#allocation2 + $0x138] sm:$0xff] %vm435_vm0, %v2175_v0  ;;  %493 = vst.msk [vmem:[#allocation2 + $0x28] sm:$0xff] %vm435_vm0, %v476_v1 }
  0xbb   : > { %494 = vst.msk [vmem:[#allocation2 + $0x30] sm:$0xff] %vm435_vm0, %v477_v2  ;;  %495 = vst.msk [vmem:[#allocation2 + $0x48] sm:$0xff] %vm435_vm0, %v478_v3 }
  0xbc   : > { %496 = vst.msk [vmem:[#allocation2 + $0x50] sm:$0xff] %vm435_vm0, %v479_v4  ;;  %497 = vst.msk [vmem:[#allocation2 + $0x68] sm:$0xff] %vm435_vm0, %v480_v5 }
  0xbd   : > { %498 = vst.msk [vmem:[#allocation2 + $0x70] sm:$0xff] %vm435_vm0, %v481_v6  ;;  %499 = vst.msk [vmem:[#allocation2 + $0x88] sm:$0xff] %vm435_vm0, %v482_v7 }
  0xbe   : > { %500 = vst.msk [vmem:[#allocation2 + $0x90] sm:$0xff] %vm435_vm0, %v483_v8  ;;  %501 = vst.msk [vmem:[#allocation2 + $0xa8] sm:$0xff] %vm435_vm0, %v484_v9  ;;  %512 = sbr.rel (%p1726_p4) target bundleno = 197 (0xc5), region = 60 }
  0xbf   : > { %502 = vst.msk [vmem:[#allocation2 + $0xb0] sm:$0xff] %vm435_vm0, %v485_v10  ;;  %503 = vst.msk [vmem:[#allocation2 + $0xc8] sm:$0xff] %vm435_vm0, %v486_v11 }
  0xc0   : > { %504 = vst.msk [vmem:[#allocation2 + $0xd0] sm:$0xff] %vm435_vm0, %v487_v12  ;;  %505 = vst.msk [vmem:[#allocation2 + $0xe8] sm:$0xff] %vm435_vm0, %v488_v13 }
  0xc1   : > { %506 = vst.msk [vmem:[#allocation2 + $0xf0] sm:$0xff] %vm435_vm0, %v489_v14  ;;  %507 = vst.msk [vmem:[#allocation2 + $0x108] sm:$0xff] %vm435_vm0, %v490_v15 }
  0xc2   : > { %508 = vst.msk [vmem:[#allocation2 + $0x110] sm:$0xff] %vm435_vm0, %v491_v16 }
  0xc3   : > { %v513_v17 = vld [vmem:[%s369_s1] sm:$0xff]  ;;  %v514_v18 = vld [vmem:[%s369_s1 + $0x8] sm:$0xff] }
  0xc4   : > { %515 = vst.msk [vmem:[#allocation2 + $0x8] sm:$0xff] %vm435_vm0, %v513_v17  ;;  %516 = vst.msk [vmem:[#allocation2 + $0x10] sm:$0xff] %vm435_vm0, %v514_v18 }
  0xc5 PF: > { %s3447_s17 = sld [smem:[#allocation22_spill]] }
  0xcb   : > { %p1727_p2 = scmp.ge.s32.totalorder %s3447_s17, 1 }
  0xcd   : > { %520 = sbr.rel (%p1727_p2) target bundleno = 212 (0xd4), region = 64 }
  0xd2   : > { %v521_v19 = vld [vmem:[%s378_s12] sm:$0xff]  ;;  %v522_v20 = vld [vmem:[%s378_s12 + $0x8] sm:$0xff] }
  0xd3   : > { %524 = vst.msk [vmem:[#allocation2 + $0x128] sm:$0xff] %vm435_vm0, %v521_v19  ;;  %525 = vst.msk [vmem:[#allocation2 + $0x130] sm:$0xff] %vm435_vm0, %v522_v20 }
  0xd4 PF: > { %v576_v21 = vlaneseq  ;;  %v566_v23 = vld [vmem:[#allocation9] sm:$0x7]  ;;  %v567_v24 = vld [vmem:[#allocation9 + $0x4] sm:$0x7]  ;;  %v527_v29 = vld [vmem:[#allocation2 + $0x8] sm:$0xff]  ;;  %s3448_s13 = sld [smem:[#allocation36_spill]] }
  0xd5   : > { %v526_v28 = vld [vmem:[#allocation2] sm:$0xff]  ;;  %v568_v34 = vld [vmem:[#allocation9 + $0x8] sm:$0x7]  ;;  %vm664_vm1 = vcmask 1046528   ;;  %vm789_vm2 = vcmask 1045504   ;;  %v528_v50 = vld [vmem:[#allocation2 + $0x10] sm:$0xff] }
  0xd6   : > { %v577_v22 = vshrl.u32 %v576_v21, 7  ;;  %v534_v30 = vld [vmem:[#allocation2 + $0x40] sm:$0xff]  ;;  %v2606_v39 = vld [vmem:[#allocation2 + $0x28] sm:$0xff]  ;;  %v2638_v62 = vld [vmem:[#allocation2 + $0x30] sm:$0xff]  ;;  %vm1478_vm3 = vcmask 261127   ;;  %vm1481_vm4 = vcmask 260096  }
  0xd7   : > { %v530_v38 = vld [vmem:[#allocation2 + $0x20] sm:$0xff]  ;;  %v2633_v59 = vld [vmem:[#allocation2 + $0x48] sm:$0xff]  ;;  %v2651_v6 = vld [vmem:[#allocation2 + $0x50] sm:$0xff]  ;;  %s3449_s4 = sld [smem:[#allocation22_spill]]  ;;  %s1522_s10 = sshll.u32 %s2575_s29, 4  ;;  %s3284_s10 = int_to_ptr.vmem [resolvable:$true] %s1522_s10 }
  0xd8   : > { %v578_v25 = vsub.s32 0, %v577_v22  ;;  %v630_v26 = vsub.s32 1, %v577_v22  ;;  %v739_v27 = vsub.s32 2, %v577_v22  ;;  %v529_v14 = vld [vmem:[#allocation2 + $0x18] sm:$0xff]  ;;  %s3450_s3 = sld [smem:[#allocation23_spill]]  ;;  %s1505_s2 = scalar_lea.sflag [#allocation5], %s2468_s23 }
  0xd9   : > { %s3451_s27 = sld [smem:[#allocation37_spill]]  ;;  %s2009_s7 = scalar_lea.vmem %s3284_s10, 2048 }
  0xda   : > { %v2591_v31 = vrot.slane %v566_v23, %v578_v25  ;;  %v2593_v32 = vrot.slane %v566_v23, %v630_v26  ;;  %v2595_v33 = vrot.slane %v566_v23, %v739_v27  ;;  %v2600_v35 = vld [vmem:[%s3448_s13] ss:$0 sm:$0xff]  ;;  %v2602_v36 = vrot.slane %v567_v24, %v578_v25  ;;  %p2010_p1 = scmp.ne.s32.totalorder %s3284_s10, %s2009_s7  ;;  %p3453_p7 = scmp.ne.s32.totalorder %s3422_s15, 0 }
  0xdb   : > { %v2604_v37 = vrot.slane %v567_v24, %v630_v26  ;;  %v2610_v42 = vrot.slane %v567_v24, %v739_v27  ;;  %v2617_v48 = vrot.slane %v568_v34, %v578_v25  ;;  %v2619_v49 = vrot.slane %v568_v34, %v630_v26  ;;  %v533_v25 = vld [vmem:[#allocation2 + $0x38] sm:$0xff]  ;;  %s2176_s12 = smov [#allocation11]  }
  0xdc   : > { %v580_v40 = vmul.f32 %v2591_v31, %v526_v28  ;;  %v632_v41 = vmul.f32 %v2593_v32, %v527_v29  ;;  %v586_v43 = vmul.f32 %v2591_v31, %v534_v30  ;;  %v741_v44 = vmul.f32 %v2595_v33, %v527_v29  ;;  %p2011_p0 = pnand %p2010_p1, %p3453_p7  ;;  %s2013_s14 = sshll.u32 %s2176_s12, 4  ;;  %s2014_s14 = int_to_ptr.vmem [resolvable:$false] %s2013_s14 }
  0xdd   : > { %v934_v45 = vmul.f32 %v2604_v37, %v2606_v39  ;;  %v2622_v51 = vmul.f32 %v2591_v31, %v530_v38  ;;  %v882_v53 = vmul.f32 %v2602_v36, %v530_v38  ;;  %v2626_v54 = vmul.f32 %v2602_v36, %v534_v30  ;;  %s1743_s28 = sshll.u32 %s3449_s4, 4  ;;  %s2015_s17 = scalar_lea.vmem %s2014_s14, 4096 }
  0xde   : > { %v604_v46 = vadd.f32 %v2600_v35, %v580_v40  ;;  %v665_v47 = vrot.slane %v632_v41, 1  ;;  %v790_v52 = vrot.slane %v741_v44, 2  ;;  %v1042_v56 = vmul.f32 %v2610_v42, %v2606_v39  ;;  %s1732_s26 = sshll.u32 %s3450_s3, 5  ;;  %p2012_p3 = pneg %p2011_p0 }
  0xdf   : > { %v2630_v57 = vrot.slane %v568_v34, %v739_v27  ;;  %v581_v58 = vmul.f32 %v2591_v31, %v527_v29  ;;  %v2636_v60 = vadd.f32 %v2600_v35, %v586_v43  ;;  %v966_v61 = vrot.slane %v934_v45, 1  ;;  %s1519_s19 = sadd.s32 %s1743_s28, %s1732_s26  ;;  %s3452_s1 = smov %s3451_s27 }
  0xe0   : > { %v713_v55 = vadd.f32 %v665_v47, %v604_v46  ;;  %v633_v63 = vmul.f32 %v2593_v32, %v528_v50  ;;  %v742_v0 = vmul.f32 %v2595_v33, %v528_v50  ;;  %v1234_v2 = vmul.f32 %v2619_v49, %v2633_v59  ;;  %s1733_s5 = sshll.u32 %s1519_s19, 7  ;;  %p2016_p8 = scmp.lt.s32.totalorder %s3284_s10, %s2014_s14 }
  0xe1   : > { %v605_v3 = vadd.f32 %v2600_v35, %v581_v58  ;;  %v2647_v4 = vmul.f32 %v2604_v37, %v2638_v62  ;;  %v1342_v5 = vmul.f32 %v2630_v57, %v2633_v59  ;;  %v1043_v9 = vmul.f32 %v2610_v42, %v2638_v62  ;;  %s3282_s30 = scalar_lea.hbm %s3451_s27, %s1733_s5  ;;  %p2017_p10 = scmp.lt.s32.totalorder %s2015_s17, %s2009_s7 }
  0xe2   : > { %v854_v1 = vadd.f32 %v790_v52, %v713_v55  ;;  %v666_v7 = vrot.slane %v633_v63, 1  ;;  %v791_v8 = vrot.slane %v742_v0, 2  ;;  %v1090_v11 = vrot.slane %v1042_v56, 2 }
  0xe3   : > { %v1182_v12 = vmul.f32 %v2617_v48, %v534_v30  ;;  %v2658_v13 = vmul.f32 %v2619_v49, %v2651_v6  ;;  %v967_v17 = vrot.slane %v2647_v4, 1  ;;  %v1343_v18 = vmul.f32 %v2630_v57, %v2651_v6  ;;  %p2018_p11 = por %p2017_p10, %p2016_p8 }
  0xe4   : > { %v906_v10 = vadd.f32 %v882_v53, %v854_v1  ;;  %v667_v15 = vsel %vm664_vm1, %v665_v47, %v666_v7  ;;  %v792_v16 = vsel %vm789_vm2, %v790_v52, %v791_v8  ;;  %v883_v21 = vmul.f32 %v2602_v36, %v2606_v39  ;;  %v537_v47 = vld [vmem:[#allocation2 + $0x58] sm:$0xff]  ;;  %v2686_v1 = vld [vmem:[#allocation2 + $0x60] sm:$0xff] }
  0xe5   : > { %v714_v20 = vadd.f32 %v667_v15, %v605_v3  ;;  %v1091_v22 = vrot.slane %v1043_v9, 2  ;;  %v1266_v23 = vrot.slane %v1234_v2, 1  ;;  %v1390_v24 = vrot.slane %v1342_v5, 2  ;;  %p2019_p9 = pnand %p2018_p11, %p2012_p3 }
  0xe6   : > { %v1014_v19 = vadd.f32 %v966_v61, %v906_v10  ;;  %v582_v26 = vmul.f32 %v2591_v31, %v528_v50  ;;  %v743_v27 = vmul.f32 %v2595_v33, %v529_v14  ;;  %v1267_v30 = vrot.slane %v2658_v13, 1 }
  0xe7   : > { %v855_v29 = vadd.f32 %v792_v16, %v714_v20  ;;  %v1391_v34 = vrot.slane %v1343_v18, 2  ;;  %v968_v38 = vsel %vm664_vm1, %v966_v61, %v967_v17  ;;  %v1183_v40 = vmul.f32 %v2617_v48, %v2633_v59 }
  0xe8   : > { %v1154_v28 = vadd.f32 %v1090_v11, %v1014_v19  ;;  %v606_v41 = vadd.f32 %v2600_v35, %v582_v26  ;;  %v793_v43 = vrot.slane %v743_v27, 2  ;;  %v1092_v46 = vsel %vm789_vm2, %v1090_v11, %v1091_v22 }
  0xe9   : > { %v907_v45 = vadd.f32 %v883_v21, %v855_v29  ;;  %v2676_v50 = vmul.f32 %v2595_v33, %v533_v25  ;;  %v884_v55 = vmul.f32 %v2602_v36, %v2638_v62  ;;  %v1044_v56 = vmul.f32 %v2610_v42, %v533_v25 }
  0xea   : > { %v1206_v44 = vadd.f32 %v1182_v12, %v1154_v28  ;;  %v715_v52 = vadd.f32 %v666_v7, %v606_v41  ;;  %v794_v53 = vsel %vm789_vm2, %v791_v8, %v793_v43  ;;  %v1268_v63 = vsel %vm664_vm1, %v1266_v23, %v1267_v30 }
  0xeb   : > { %v1015_v61 = vadd.f32 %v968_v38, %v907_v45  ;;  %v1392_v0 = vsel %vm789_vm2, %v1390_v24, %v1391_v34  ;;  %v2689_v2 = vmul.f32 %v2595_v33, %v537_v47  ;;  %v1093_v4 = vrot.slane %v1044_v56, 2 }
  0xec   : > { %v1314_v58 = vadd.f32 %v1266_v23, %v1206_v44  ;;  %v856_v3 = vadd.f32 %v794_v53, %v715_v52  ;;  %v1344_v5 = vmul.f32 %v2630_v57, %v537_v47  ;;  %v798_v9 = vrot.slane %v2676_v50, 2 }
  0xed   : > { %v1155_v8 = vadd.f32 %v1092_v46, %v1015_v61  ;;  %v2694_v10 = vmul.f32 %v2610_v42, %v537_v47  ;;  %v589_v14 = vmul.f32 %v2591_v31, %v2686_v1  ;;  %v607_v15 = vadd.f32 %v2600_v35, %v2622_v51  ;;  %v2723_v46 = vld [vmem:[#allocation2 + $0x68] sm:$0xff]  ;;  %v2736_v61 = vld [vmem:[#allocation2 + $0x70] sm:$0xff] }
  0xee   : > { %v1454_v7 = vadd.f32 %v1390_v24, %v1314_v58  ;;  %v908_v11 = vadd.f32 %v884_v55, %v856_v3  ;;  %v1393_v12 = vrot.slane %v1344_v5, 2  ;;  %v1094_v18 = vsel %vm789_vm2, %v1091_v22, %v1093_v4 }
  0xef   : > { %v1207_v16 = vadd.f32 %v1183_v40, %v1155_v8  ;;  %v634_v19 = vmul.f32 %v2593_v32, %v2606_v39  ;;  %v744_v20 = vmul.f32 %v2595_v33, %v2606_v39  ;;  %v803_v21 = vrot.slane %v2689_v2, 2 }
  0xf0   : > { %1479 = vst.msk [vmem:[%s2575_s29 - $0x7] sm:$0x80] %vm1478_vm3, %v1454_v7  ;;  %v1016_v23 = vadd.f32 %v967_v17, %v908_v11  ;;  %v1184_v24 = vmul.f32 %v2617_v48, %v2651_v6  ;;  %v936_v51 = vmul.f32 %v2604_v37, %v2633_v59  ;;  %v1045_v27 = vmul.f32 %v2610_v42, %v2633_v59 }
  0xf1   : > { %v1315_v25 = vadd.f32 %v1268_v63, %v1207_v16  ;;  %v668_v26 = vrot.slane %v634_v19, 1  ;;  %v795_v22 = vrot.slane %v744_v20, 2  ;;  %v1098_v28 = vrot.slane %v2694_v10, 2 }
  0xf2   : > { %v1156_v29 = vadd.f32 %v1094_v18, %v1016_v23  ;;  %v1394_v38 = vsel %vm789_vm2, %v1391_v34, %v1393_v12  ;;  %v2717_v17 = vadd.f32 %v2600_v35, %v589_v14  ;;  %v1185_v43 = vmul.f32 %v2617_v48, %v2686_v1  ;;  %v541_v18 = vld [vmem:[#allocation2 + $0x78] sm:$0xff] }
  0xf3   : > { %v1455_v40 = vadd.f32 %v1392_v0, %v1315_v25  ;;  %v716_v41 = vadd.f32 %v668_v26, %v607_v15  ;;  %v584_v44 = vmul.f32 %v2591_v31, %v2606_v39  ;;  %v969_v47 = vrot.slane %v936_v51, 1 }
  0xf4   : > { %v1208_v45 = vadd.f32 %v1184_v24, %v1156_v29  ;;  %v635_v52 = vmul.f32 %v2593_v32, %v2638_v62  ;;  %v745_v34 = vmul.f32 %v2595_v33, %v2638_v62  ;;  %v1095_v55 = vrot.slane %v1045_v27, 2 }
  0xf5   : > { %1480 = vst.msk [vmem:[%s2575_s29 + $0x1] sm:$0xff] %vm435_vm0, %v1455_v40  ;;  %v857_v53 = vadd.f32 %v795_v22, %v716_v41  ;;  %v1236_v56 = vmul.f32 %v2619_v49, %v2723_v46  ;;  %v608_v58 = vadd.f32 %v2600_v35, %v584_v44  ;;  %v937_v3 = vmul.f32 %v2604_v37, %v2651_v6 }
  0xf6   : > { %v1316_v39 = vadd.f32 %v1267_v30, %v1208_v45  ;;  %v669_v63 = vrot.slane %v635_v52, 1  ;;  %v796_v0 = vrot.slane %v745_v34, 2  ;;  %v1345_v5 = vmul.f32 %v2630_v57, %v2723_v46 }
  0xf7   : > { %v909_v4 = vadd.f32 %v2626_v54, %v857_v53  ;;  %v1046_v7 = vmul.f32 %v2610_v42, %v2651_v6  ;;  %v2747_v13 = vmul.f32 %v2619_v49, %v2736_v61  ;;  %v970_v12 = vrot.slane %v937_v3, 1 }
  0xf8   : > { %v1456_v30 = vadd.f32 %v1394_v38, %v1316_v39  ;;  %v670_v8 = vsel %vm664_vm1, %v668_v26, %v669_v63  ;;  %v797_v11 = vsel %vm789_vm2, %v795_v22, %v796_v0  ;;  %v1269_v15 = vrot.slane %v1236_v56, 1 }
  0xf9   : > { %v1017_v14 = vadd.f32 %v969_v47, %v909_v4  ;;  %v717_v16 = vadd.f32 %v670_v8, %v608_v58  ;;  %v886_v54 = vmul.f32 %v2602_v36, %v2633_v59  ;;  %v1096_v19 = vrot.slane %v1046_v7, 2 }
  0xfa   : > { %1482 = vst.msk [vmem:[%s2575_s29 + $0x9] sm:$0x7f] %vm1481_vm4, %v1456_v30  ;;  %v1270_v20 = vrot.slane %v2747_v13, 1  ;;  %v1346_v23 = vmul.f32 %v2630_v57, %v2736_v61  ;;  %v585_v24 = vmul.f32 %v2591_v31, %v2638_v62  ;;  %v888_v51 = vmul.f32 %v2602_v36, %v2686_v1 }
  0xfb   : > { %v1157_v25 = vadd.f32 %v1095_v55, %v1017_v14  ;;  %v1395_v26 = vrot.slane %v1345_v5, 2  ;;  %v858_v22 = vadd.f32 %v797_v11, %v717_v16  ;;  %v971_v27 = vsel %vm664_vm1, %v969_v47, %v970_v12  ;;  %v542_v5 = vld [vmem:[#allocation2 + $0x80] sm:$0xff] }
  0xfc   : > { %v1186_v29 = vmul.f32 %v2617_v48, %v2723_v46  ;;  %v609_v38 = vadd.f32 %v2600_v35, %v585_v24  ;;  %v2767_v40 = vmul.f32 %v2595_v33, %v541_v18  ;;  %v1396_v45 = vrot.slane %v1346_v23, 2 }
  0xfd   : > { %v1209_v41 = vadd.f32 %v1185_v43, %v1157_v25  ;;  %v910_v44 = vadd.f32 %v886_v54, %v858_v22  ;;  %v799_v62 = vsel %vm789_vm2, %v796_v0, %v798_v9  ;;  %v1097_v1 = vsel %vm789_vm2, %v1095_v55, %v1096_v19 }
  0xfe   : > { %v1271_v47 = vsel %vm664_vm1, %v1269_v15, %v1270_v20  ;;  %v718_v52 = vadd.f32 %v669_v63, %v609_v38  ;;  %v887_v34 = vmul.f32 %v2602_v36, %v2651_v6  ;;  %v2779_v43 = vmul.f32 %v2610_v42, %v541_v18 }
  0xff   : > { %v1317_v53 = vadd.f32 %v1269_v15, %v1209_v41  ;;  %v1018_v56 = vadd.f32 %v971_v27, %v910_v44  ;;  %v1347_v50 = vmul.f32 %v2630_v57, %v541_v18  ;;  %v808_v9 = vrot.slane %v2767_v40, 2  ;;  %v2807_v27 = vld [vmem:[#allocation2 + $0x88] sm:$0xff] }
 0x100   : > { %v859_v58 = vadd.f32 %v799_v62, %v718_v52  ;;  %v636_v55 = vmul.f32 %v2593_v32, %v2633_v59  ;;  %v747_v39 = vmul.f32 %v2595_v33, %v2633_v59  ;;  %v1397_v3 = vsel %vm789_vm2, %v1395_v26, %v1396_v45 }
 0x101   : > { %v1457_v63 = vadd.f32 %v1395_v26, %v1317_v53  ;;  %v1158_v0 = vadd.f32 %v1097_v1, %v1018_v56  ;;  %v1398_v4 = vrot.slane %v1347_v50, 2  ;;  %v1099_v30 = vsel %vm789_vm2, %v1096_v19, %v1098_v28 }
 0x102   : > { %v911_v7 = vadd.f32 %v887_v34, %v859_v58  ;;  %v671_v8 = vrot.slane %v636_v55, 1  ;;  %v800_v11 = vrot.slane %v747_v39, 2  ;;  %v1103_v15 = vrot.slane %v2779_v43, 2  ;;  %v2820_v34 = vld [vmem:[#allocation2 + $0x90] sm:$0xff] }
 0x103   : > { %1483 = vst.msk [vmem:[%s2575_s29 + $0x9] sm:$0x80] %vm1478_vm3, %v1457_v63  ;;  %v1210_v14 = vadd.f32 %v1186_v29, %v1158_v0  ;;  %v1187_v16 = vmul.f32 %v2617_v48, %v2736_v61  ;;  %v938_v54 = vmul.f32 %v2604_v37, %v2723_v46  ;;  %v592_v23 = vmul.f32 %v2591_v31, %v542_v5 }
 0x104   : > { %v1019_v18 = vadd.f32 %v970_v12, %v911_v7  ;;  %v719_v10 = vadd.f32 %v671_v8, %v2636_v60  ;;  %v1048_v28 = vmul.f32 %v2610_v42, %v2723_v46  ;;  %v1399_v24 = vsel %vm789_vm2, %v1396_v45, %v1398_v4 }
 0x105   : > { %v1318_v19 = vadd.f32 %v1271_v47, %v1210_v14  ;;  %v2804_v25 = vmul.f32 %v2602_v36, %v542_v5  ;;  %v1188_v26 = vmul.f32 %v2617_v48, %v542_v5  ;;  %v972_v29 = vrot.slane %v938_v54, 1 }
 0x106   : > { %v1159_v22 = vadd.f32 %v1099_v30, %v1019_v18  ;;  %v860_v12 = vadd.f32 %v800_v11, %v719_v10  ;;  %v587_v60 = vmul.f32 %v2591_v31, %v2633_v59  ;;  %v1238_v41 = vmul.f32 %v2619_v49, %v2807_v27 }
 0x107   : > { %v1458_v38 = vadd.f32 %v1397_v3, %v1318_v19  ;;  %v637_v44 = vmul.f32 %v2593_v32, %v2651_v6  ;;  %v748_v45 = vmul.f32 %v2595_v33, %v2651_v6  ;;  %v1100_v47 = vrot.slane %v1048_v28, 2 }
 0x108   : > { %v1211_v62 = vadd.f32 %v1187_v16, %v1159_v22  ;;  %v912_v1 = vadd.f32 %v888_v51, %v860_v12  ;;  %v611_v52 = vadd.f32 %v2600_v35, %v587_v60  ;;  %v939_v56 = vmul.f32 %v2604_v37, %v2736_v61 }
 0x109   : > { %1484 = vst.msk [vmem:[%s2575_s29 + $0x11] sm:$0xff] %vm435_vm0, %v1458_v38  ;;  %v672_v59 = vrot.slane %v637_v44, 1  ;;  %v801_v53 = vrot.slane %v748_v45, 2  ;;  %v1049_v50 = vmul.f32 %v2610_v42, %v2736_v61  ;;  %v1348_v51 = vmul.f32 %v2630_v57, %v2807_v27 }
 0x10a   : > { %v1319_v58 = vadd.f32 %v1270_v20, %v1211_v62  ;;  %v1020_v55 = vadd.f32 %v972_v29, %v912_v1  ;;  %v2832_v39 = vmul.f32 %v2619_v49, %v2820_v34  ;;  %v1272_v63 = vrot.slane %v1238_v41, 1  ;;  %v545_v20 = vld [vmem:[#allocation2 + $0x98] sm:$0xff] }
 0x10b   : > { %v673_v0 = vsel %vm664_vm1, %v671_v8, %v672_v59  ;;  %v802_v3 = vsel %vm789_vm2, %v800_v11, %v801_v53  ;;  %v973_v4 = vrot.slane %v939_v56, 1  ;;  %v889_v13 = vmul.f32 %v2602_v36, %v2723_v46 }
 0x10c   : > { %v1459_v5 = vadd.f32 %v1399_v24, %v1319_v58  ;;  %v1160_v7 = vadd.f32 %v1100_v47, %v1020_v55  ;;  %v720_v30 = vadd.f32 %v673_v0, %v611_v52  ;;  %v1101_v14 = vrot.slane %v1049_v50, 2  ;;  %v546_v58 = vld [vmem:[#allocation2 + $0xa0] sm:$0xff] }
 0x10d   : > { %v1273_v16 = vrot.slane %v2832_v39, 1  ;;  %v1349_v54 = vmul.f32 %v2630_v57, %v2820_v34  ;;  %v588_v18 = vmul.f32 %v2591_v31, %v2651_v6  ;;  %v2846_v8 = vadd.f32 %v2600_v35, %v592_v23 }
 0x10e   : > { %1485 = vst.msk [vmem:[%s2575_s29 + $0x19] sm:$0x7f] %vm1481_vm4, %v1459_v5  ;;  %v1212_v11 = vadd.f32 %v1188_v26, %v1160_v7  ;;  %v1400_v10 = vrot.slane %v1348_v51, 2  ;;  %v861_v28 = vadd.f32 %v802_v3, %v720_v30  ;;  %v974_v19 = vsel %vm664_vm1, %v972_v29, %v973_v4 }
 0x10f   : > { %v1189_v24 = vmul.f32 %v2617_v48, %v2807_v27  ;;  %v612_v22 = vadd.f32 %v2600_v35, %v588_v18  ;;  %v2853_v12 = vmul.f32 %v2595_v33, %v545_v20  ;;  %v1401_v38 = vrot.slane %v1349_v54, 2  ;;  %v2887_v18 = vld [vmem:[#allocation2 + $0xa8] sm:$0xff] }
 0x110   : > { %v1320_v60 = vadd.f32 %v1272_v63, %v1212_v11  ;;  %v913_v6 = vadd.f32 %v889_v13, %v861_v28  ;;  %v804_v23 = vsel %vm789_vm2, %v801_v53, %v803_v21  ;;  %v1102_v26 = vsel %vm789_vm2, %v1100_v47, %v1101_v14 }
 0x111   : > { %v1274_v29 = vsel %vm664_vm1, %v1272_v63, %v1273_v16  ;;  %v721_v41 = vadd.f32 %v672_v59, %v612_v22  ;;  %v890_v44 = vmul.f32 %v2602_v36, %v2736_v61  ;;  %v2865_v1 = vmul.f32 %v2610_v42, %v545_v20 }
 0x112   : > { %v1460_v45 = vadd.f32 %v1400_v10, %v1320_v60  ;;  %v1021_v62 = vadd.f32 %v974_v19, %v913_v6  ;;  %v1350_v52 = vmul.f32 %v2630_v57, %v545_v20  ;;  %v813_v2 = vrot.slane %v2853_v12, 2 }
 0x113   : > { %v862_v21 = vadd.f32 %v804_v23, %v721_v41  ;;  %v638_v47 = vmul.f32 %v2593_v32, %v2723_v46  ;;  %v750_v53 = vmul.f32 %v2595_v33, %v2723_v46  ;;  %v1402_v56 = vsel %vm789_vm2, %v1400_v10, %v1401_v38 }
 0x114   : > { %1486 = vst.msk [vmem:[%s2575_s29 + $0x19] sm:$0x80] %vm1478_vm3, %v1460_v45  ;;  %v1161_v59 = vadd.f32 %v1102_v26, %v1021_v62  ;;  %v1403_v50 = vrot.slane %v1350_v52, 2  ;;  %v940_v55 = vmul.f32 %v2604_v37, %v2807_v27  ;;  %v1104_v63 = vsel %vm789_vm2, %v1101_v14, %v1103_v15 }
 0x115   : > { %v914_v51 = vadd.f32 %v890_v44, %v862_v21  ;;  %v674_v0 = vrot.slane %v638_v47, 1  ;;  %v805_v3 = vrot.slane %v750_v53, 2  ;;  %v1108_v7 = vrot.slane %v2865_v1, 2  ;;  %v2906_v44 = vld [vmem:[#allocation2 + $0xb0] sm:$0xff] }
 0x116   : > { %v1213_v5 = vadd.f32 %v1189_v24, %v1161_v59  ;;  %v1190_v30 = vmul.f32 %v2617_v48, %v2820_v34  ;;  %v1051_v13 = vmul.f32 %v2610_v42, %v2807_v27  ;;  %v1404_v54 = vsel %vm789_vm2, %v1401_v38, %v1403_v50 }
 0x117   : > { %v1022_v20 = vadd.f32 %v973_v4, %v914_v51  ;;  %v595_v43 = vmul.f32 %v2591_v31, %v546_v58  ;;  %v722_v15 = vadd.f32 %v674_v0, %v2717_v17  ;;  %v975_v11 = vrot.slane %v940_v55, 1 }
 0x118   : > { %v1321_v14 = vadd.f32 %v1274_v29, %v1213_v5  ;;  %v1240_v10 = vmul.f32 %v2619_v49, %v2887_v18  ;;  %v590_v28 = vmul.f32 %v2591_v31, %v2723_v46  ;;  %v1191_v4 = vmul.f32 %v2617_v48, %v546_v58 }
 0x119   : > { %v1162_v19 = vadd.f32 %v1104_v63, %v1022_v20  ;;  %v863_v24 = vadd.f32 %v805_v3, %v722_v15  ;;  %v639_v22 = vmul.f32 %v2593_v32, %v2736_v61  ;;  %v1105_v6 = vrot.slane %v1051_v13, 2  ;;  %v549_v13 = vld [vmem:[#allocation2 + $0xb8] sm:$0xff] }
 0x11a   : > { %v1461_v60 = vadd.f32 %v1402_v56, %v1321_v14  ;;  %v614_v17 = vadd.f32 %v2600_v35, %v590_v28  ;;  %v751_v38 = vmul.f32 %v2595_v33, %v2736_v61  ;;  %v1351_v46 = vmul.f32 %v2630_v57, %v2887_v18 }
 0x11b   : > { %v1214_v23 = vadd.f32 %v1190_v30, %v1162_v19  ;;  %v915_v26 = vadd.f32 %v2804_v25, %v863_v24  ;;  %v675_v29 = vrot.slane %v639_v22, 1  ;;  %v1275_v41 = vrot.slane %v1240_v10, 1 }
 0x11c   : > { %1487 = vst.msk [vmem:[%s2575_s29 + $0x21] sm:$0xff] %vm435_vm0, %v1461_v60  ;;  %v806_v45 = vrot.slane %v751_v38, 2  ;;  %v941_v62 = vmul.f32 %v2604_v37, %v2820_v34  ;;  %v1052_v52 = vmul.f32 %v2610_v42, %v2820_v34  ;;  %v2917_v53 = vmul.f32 %v2619_v49, %v2906_v44 }
 0x11d   : > { %v1322_v21 = vadd.f32 %v1273_v16, %v1214_v23  ;;  %v1023_v25 = vadd.f32 %v975_v11, %v915_v26  ;;  %v676_v47 = vsel %vm664_vm1, %v674_v0, %v675_v29  ;;  %v892_v50 = vmul.f32 %v2602_v36, %v2807_v27 }
 0x11e   : > { %v723_v59 = vadd.f32 %v676_v47, %v614_v17  ;;  %v807_v56 = vsel %vm789_vm2, %v805_v3, %v806_v45  ;;  %v976_v55 = vrot.slane %v941_v62, 1  ;;  %v1106_v5 = vrot.slane %v1052_v52, 2 }
 0x11f   : > { %v1462_v51 = vadd.f32 %v1404_v54, %v1322_v21  ;;  %v1163_v63 = vadd.f32 %v1105_v6, %v1023_v25  ;;  %v1352_v39 = vmul.f32 %v2630_v57, %v2906_v44  ;;  %v2925_v16 = vmul.f32 %v2602_v36, %v546_v58 }
 0x120   : > { %v864_v0 = vadd.f32 %v807_v56, %v723_v59  ;;  %v1276_v30 = vrot.slane %v2917_v53, 1  ;;  %v591_v3 = vmul.f32 %v2591_v31, %v2736_v61  ;;  %v1405_v15 = vrot.slane %v1351_v46, 2 }
 0x121   : > { %1488 = vst.msk [vmem:[%s2575_s29 + $0x29] sm:$0x7f] %vm1481_vm4, %v1462_v51  ;;  %v1215_v20 = vadd.f32 %v1191_v4, %v1163_v63  ;;  %v977_v54 = vsel %vm664_vm1, %v975_v11, %v976_v55  ;;  %v1406_v14 = vrot.slane %v1352_v39, 2  ;;  %v2934_v10 = vadd.f32 %v2600_v35, %v595_v43 }
 0x122   : > { %v916_v28 = vadd.f32 %v892_v50, %v864_v0  ;;  %v1192_v58 = vmul.f32 %v2617_v48, %v2887_v18  ;;  %v615_v19 = vadd.f32 %v2600_v35, %v591_v3  ;;  %v1107_v22 = vsel %vm789_vm2, %v1105_v6, %v1106_v5 }
 0x123   : > { %v1323_v24 = vadd.f32 %v1275_v41, %v1215_v20  ;;  %v2941_v61 = vmul.f32 %v2595_v33, %v549_v13  ;;  %v809_v11 = vsel %vm789_vm2, %v806_v45, %v808_v9  ;;  %v1277_v43 = vsel %vm664_vm1, %v1275_v41, %v1276_v30  ;;  %v2956_v9 = vld [vmem:[#allocation2 + $0xc0] sm:$0xff] }
 0x124   : > { %v1024_v4 = vadd.f32 %v977_v54, %v916_v28  ;;  %v724_v60 = vadd.f32 %v675_v29, %v615_v19  ;;  %v893_v17 = vmul.f32 %v2602_v36, %v2820_v34  ;;  %v1407_v6 = vsel %vm789_vm2, %v1405_v15, %v1406_v14 }
 0x125   : > { %v1463_v38 = vadd.f32 %v1405_v15, %v1323_v24  ;;  %v2953_v23 = vmul.f32 %v2610_v42, %v549_v13  ;;  %v1353_v26 = vmul.f32 %v2630_v57, %v549_v13  ;;  %v640_v45 = vmul.f32 %v2593_v32, %v2807_v27  ;;  %v2979_v13 = vld [vmem:[#allocation2 + $0xc8] sm:$0xff] }
 0x126   : > { %v1164_v40 = vadd.f32 %v1107_v22, %v1024_v4  ;;  %v865_v46 = vadd.f32 %v809_v11, %v724_v60  ;;  %v753_v29 = vmul.f32 %v2595_v33, %v2807_v27  ;;  %v818_v41 = vrot.slane %v2941_v61, 2 }
 0x127   : > { %1489 = vst.msk [vmem:[%s2575_s29 + $0x29] sm:$0x80] %vm1478_vm3, %v1463_v38  ;;  %v1109_v62 = vsel %vm789_vm2, %v1106_v5, %v1108_v7  ;;  %v1408_v52 = vrot.slane %v1353_v26, 2  ;;  %v942_v21 = vmul.f32 %v2604_v37, %v2887_v18  ;;  %v677_v59 = vrot.slane %v640_v45, 1 }
 0x128   : > { %v1216_v25 = vadd.f32 %v1192_v58, %v1164_v40  ;;  %v917_v47 = vadd.f32 %v893_v17, %v865_v46  ;;  %v810_v56 = vrot.slane %v753_v29, 2  ;;  %v1113_v50 = vrot.slane %v2953_v23, 2  ;;  %v3008_v40 = vld [vmem:[#allocation2 + $0xd0] sm:$0xff] }
 0x129   : > { %v1193_v51 = vmul.f32 %v2617_v48, %v2906_v44  ;;  %v598_v63 = vmul.f32 %v2591_v31, %v2956_v9  ;;  %v1054_v1 = vmul.f32 %v2610_v42, %v2887_v18  ;;  %v1409_v39 = vsel %vm789_vm2, %v1406_v14, %v1408_v52 }
 0x12a   : > { %v1324_v7 = vadd.f32 %v1277_v43, %v1216_v25  ;;  %v1025_v5 = vadd.f32 %v976_v55, %v917_v47  ;;  %v725_v0 = vadd.f32 %v677_v59, %v2846_v8  ;;  %v978_v3 = vrot.slane %v942_v21, 1  ;;  %v553_v25 = vld [vmem:[#allocation2 + $0xd8] sm:$0xff] }
 0x12b   : > { %v1194_v20 = vmul.f32 %v2617_v48, %v2956_v9  ;;  %v593_v15 = vmul.f32 %v2591_v31, %v2807_v27  ;;  %v641_v54 = vmul.f32 %v2593_v32, %v2820_v34  ;;  %v1242_v14 = vmul.f32 %v2619_v49, %v2979_v13 }
 0x12c   : > { %v1464_v28 = vadd.f32 %v1407_v6, %v1324_v7  ;;  %v1165_v58 = vadd.f32 %v1109_v62, %v1025_v5  ;;  %v866_v55 = vadd.f32 %v810_v56, %v725_v0  ;;  %v1110_v19 = vrot.slane %v1054_v1, 2 }
 0x12d   : > { %v617_v8 = vadd.f32 %v2600_v35, %v593_v15  ;;  %v678_v24 = vrot.slane %v641_v54, 1  ;;  %v754_v22 = vmul.f32 %v2595_v33, %v2820_v34  ;;  %v1354_v4 = vmul.f32 %v2630_v57, %v2979_v13 }
 0x12e   : > { %1490 = vst.msk [vmem:[%s2575_s29 + $0x31] sm:$0xff] %vm435_vm0, %v1464_v28  ;;  %v1217_v11 = vadd.f32 %v1193_v51, %v1165_v58  ;;  %v918_v27 = vadd.f32 %v2925_v16, %v866_v55  ;;  %v2999_v43 = vmul.f32 %v2604_v37, %v2906_v44  ;;  %v895_v38 = vmul.f32 %v2602_v36, %v2887_v18 }
 0x12f   : > { %v679_v60 = vsel %vm664_vm1, %v677_v59, %v678_v24  ;;  %v811_v17 = vrot.slane %v754_v22, 2  ;;  %v1055_v6 = vmul.f32 %v2610_v42, %v2906_v44  ;;  %v3014_v52 = vmul.f32 %v2619_v49, %v3008_v40 }
 0x130   : > { %v1325_v26 = vadd.f32 %v1276_v30, %v1217_v11  ;;  %v1026_v16 = vadd.f32 %v978_v3, %v918_v27  ;;  %v726_v46 = vadd.f32 %v679_v60, %v617_v8  ;;  %v979_v45 = vrot.slane %v2999_v43, 1  ;;  %v554_v60 = vld [vmem:[#allocation2 + $0xe0] sm:$0xff] }
 0x131   : > { %v812_v29 = vsel %vm789_vm2, %v810_v56, %v811_v17  ;;  %v1111_v62 = vrot.slane %v1055_v6, 2  ;;  %v1355_v21 = vmul.f32 %v2630_v57, %v3008_v40  ;;  %v1278_v47 = vrot.slane %v1242_v14, 1 }
 0x132   : > { %v1465_v53 = vadd.f32 %v1409_v39, %v1325_v26  ;;  %v1166_v30 = vadd.f32 %v1110_v19, %v1026_v16  ;;  %v867_v59 = vadd.f32 %v812_v29, %v726_v46  ;;  %v1410_v51 = vrot.slane %v1354_v4, 2 }
 0x133   : > { %v980_v1 = vsel %vm664_vm1, %v978_v3, %v979_v45  ;;  %v1279_v7 = vrot.slane %v3014_v52, 1  ;;  %v594_v56 = vmul.f32 %v2591_v31, %v2820_v34  ;;  %v1411_v15 = vrot.slane %v1355_v21, 2 }
 0x134   : > { %1491 = vst.msk [vmem:[%s2575_s29 + $0x39] sm:$0x7f] %vm1481_vm4, %v1465_v53  ;;  %v1218_v5 = vadd.f32 %v1194_v20, %v1166_v30  ;;  %v919_v0 = vadd.f32 %v895_v38, %v867_v59  ;;  %v3025_v54 = vmul.f32 %v2595_v33, %v553_v25  ;;  %v3028_v39 = vadd.f32 %v2600_v35, %v598_v63 }
 0x135   : > { %v897_v28 = vmul.f32 %v2602_v36, %v2956_v9  ;;  %v1112_v3 = vsel %vm789_vm2, %v1110_v19, %v1111_v62  ;;  %v618_v58 = vadd.f32 %v2600_v35, %v594_v56  ;;  %v1195_v20 = vmul.f32 %v2617_v48, %v2979_v13 }
 0x136   : > { %v1326_v55 = vadd.f32 %v1278_v47, %v1218_v5  ;;  %v1027_v34 = vadd.f32 %v980_v1, %v919_v0  ;;  %v814_v14 = vsel %vm789_vm2, %v811_v17, %v813_v2  ;;  %v1280_v63 = vsel %vm664_vm1, %v1278_v47, %v1279_v7  ;;  %v3064_v47 = vld [vmem:[#allocation2 + $0xe8] sm:$0xff] }
 0x137   : > { %v727_v8 = vadd.f32 %v678_v24, %v618_v58  ;;  %v896_v9 = vmul.f32 %v2602_v36, %v2906_v44  ;;  %v1356_v19 = vmul.f32 %v2630_v57, %v553_v25  ;;  %v1412_v27 = vsel %vm789_vm2, %v1410_v51, %v1411_v15 }
 0x138   : > { %v1466_v22 = vadd.f32 %v1410_v51, %v1326_v55  ;;  %v1167_v11 = vadd.f32 %v1112_v3, %v1027_v34  ;;  %v823_v4 = vrot.slane %v3025_v54, 2  ;;  %v642_v2 = vmul.f32 %v2593_v32, %v2887_v18 }
 0x139   : > { %v868_v43 = vadd.f32 %v814_v14, %v727_v8  ;;  %v1413_v12 = vrot.slane %v1356_v19, 2  ;;  %v756_v24 = vmul.f32 %v2595_v33, %v2887_v18  ;;  %v3054_v38 = vmul.f32 %v2610_v42, %v553_v25 }
 0x13a   : > { %1492 = vst.msk [vmem:[%s2575_s29 + $0x39] sm:$0x80] %vm1478_vm3, %v1466_v22  ;;  %v1219_v17 = vadd.f32 %v1195_v20, %v1167_v11  ;;  %v1114_v6 = vsel %vm789_vm2, %v1111_v62, %v1113_v50  ;;  %v944_v26 = vmul.f32 %v2604_v37, %v2979_v13  ;;  %v1196_v46 = vmul.f32 %v2617_v48, %v3008_v40 }
 0x13b   : > { %v920_v16 = vadd.f32 %v896_v9, %v868_v43  ;;  %v680_v29 = vrot.slane %v642_v2, 1  ;;  %v815_v21 = vrot.slane %v756_v24, 2  ;;  %v1414_v30 = vsel %vm789_vm2, %v1411_v15, %v1413_v12 }
 0x13c   : > { %v1327_v53 = vadd.f32 %v1280_v63, %v1219_v17  ;;  %v601_v25 = vmul.f32 %v2591_v31, %v554_v60  ;;  %v1057_v23 = vmul.f32 %v2610_v42, %v2979_v13  ;;  %v981_v59 = vrot.slane %v944_v26, 1  ;;  %v3084_v63 = vld [vmem:[#allocation2 + $0xf0] sm:$0xff] }
 0x13d   : > { %v1028_v50 = vadd.f32 %v979_v45, %v920_v16  ;;  %v728_v62 = vadd.f32 %v680_v29, %v2934_v10  ;;  %v1244_v51 = vmul.f32 %v2619_v49, %v3064_v47  ;;  %v1197_v56 = vmul.f32 %v2617_v48, %v554_v60 }
 0x13e   : > { %v1467_v1 = vadd.f32 %v1412_v27, %v1327_v53  ;;  %v596_v5 = vmul.f32 %v2591_v31, %v2887_v18  ;;  %v643_v0 = vmul.f32 %v2593_v32, %v2906_v44  ;;  %v1115_v58 = vrot.slane %v1057_v23, 2 }
 0x13f   : > { %v1168_v15 = vadd.f32 %v1114_v6, %v1028_v50  ;;  %v869_v3 = vadd.f32 %v815_v21, %v728_v62  ;;  %v1357_v45 = vmul.f32 %v2630_v57, %v3064_v47  ;;  %v1281_v10 = vrot.slane %v1244_v51, 1  ;;  %v557_v50 = vld [vmem:[#allocation2 + $0xf8] sm:$0xff] }
 0x140   : > { %1493 = vst.msk [vmem:[%s2575_s29 + $0x41] sm:$0xff] %vm435_vm0, %v1467_v1  ;;  %v620_v55 = vadd.f32 %v2600_v35, %v596_v5  ;;  %v681_v34 = vrot.slane %v643_v0, 1  ;;  %v757_v20 = vmul.f32 %v2595_v33, %v2906_v44  ;;  %v3088_v8 = vmul.f32 %v2604_v37, %v3008_v40 }
 0x141   : > { %v1220_v14 = vadd.f32 %v1196_v46, %v1168_v15  ;;  %v921_v18 = vadd.f32 %v897_v28, %v869_v3  ;;  %v1058_v9 = vmul.f32 %v2610_v42, %v3008_v40  ;;  %v898_v11 = vmul.f32 %v2602_v36, %v2979_v13 }
 0x142   : > { %v682_v19 = vsel %vm664_vm1, %v680_v29, %v681_v34  ;;  %v816_v22 = vrot.slane %v757_v20, 2  ;;  %v3097_v27 = vmul.f32 %v2619_v49, %v3084_v63  ;;  %v982_v2 = vrot.slane %v3088_v8, 1 }
 0x143   : > { %v1328_v28 = vadd.f32 %v1279_v7, %v1220_v14  ;;  %v1029_v43 = vadd.f32 %v981_v59, %v921_v18  ;;  %v729_v12 = vadd.f32 %v682_v19, %v620_v55  ;;  %v1116_v17 = vrot.slane %v1058_v9, 2 }
 0x144   : > { %v817_v24 = vsel %vm789_vm2, %v815_v21, %v816_v22  ;;  %v1282_v6 = vrot.slane %v3097_v27, 1  ;;  %v1358_v26 = vmul.f32 %v2630_v57, %v3084_v63  ;;  %v1118_v16 = vrot.slane %v3054_v38, 2 }
 0x145   : > { %v1468_v46 = vadd.f32 %v1414_v30, %v1328_v28  ;;  %v1169_v29 = vadd.f32 %v1115_v58, %v1029_v43  ;;  %v870_v53 = vadd.f32 %v817_v24, %v729_v12  ;;  %v1415_v52 = vrot.slane %v1357_v45, 2 }
 0x146   : > { %v983_v7 = vsel %vm664_vm1, %v981_v59, %v982_v2  ;;  %v1416_v23 = vrot.slane %v1358_v26, 2  ;;  %v597_v62 = vmul.f32 %v2591_v31, %v2906_v44  ;;  %v3113_v21 = vadd.f32 %v2600_v35, %v601_v25  ;;  %v558_v26 = vld [vmem:[#allocation2 + $0x100] sm:$0xff] }
 0x147   : > { %1494 = vst.msk [vmem:[%s2575_s29 + $0x49] sm:$0x7f] %vm1481_vm4, %v1468_v46  ;;  %v900_v51 = vmul.f32 %v2602_v36, %v554_v60  ;;  %v1221_v1 = vadd.f32 %v1197_v56, %v1169_v29  ;;  %v922_v38 = vadd.f32 %v898_v11, %v870_v53  ;;  %v1117_v30 = vsel %vm789_vm2, %v1115_v58, %v1116_v17 }
 0x148   : > { %v1198_v5 = vmul.f32 %v2617_v48, %v3064_v47  ;;  %v1283_v59 = vsel %vm664_vm1, %v1281_v10, %v1282_v6  ;;  %v621_v44 = vadd.f32 %v2600_v35, %v597_v62  ;;  %v3124_v25 = vmul.f32 %v2595_v33, %v557_v50 }
 0x149   : > { %v1329_v0 = vadd.f32 %v1281_v10, %v1221_v1  ;;  %v1030_v15 = vadd.f32 %v983_v7, %v922_v38  ;;  %v819_v60 = vsel %vm789_vm2, %v816_v22, %v818_v41  ;;  %v1417_v56 = vsel %vm789_vm2, %v1415_v52, %v1416_v23  ;;  %v3166_v38 = vld [vmem:[%s3448_s13] ss:$0 sm:$0xff] }
 0x14a   : > { %v730_v3 = vadd.f32 %v681_v34, %v621_v44  ;;  %v899_v58 = vmul.f32 %v2602_v36, %v3008_v40  ;;  %v1359_v45 = vmul.f32 %v2630_v57, %v557_v50  ;;  %v644_v10 = vmul.f32 %v2593_v32, %v2979_v13 }
 0x14b   : > { %v1469_v55 = vadd.f32 %v1415_v52, %v1329_v0  ;;  %v1170_v35 = vadd.f32 %v1117_v30, %v1030_v15  ;;  %v759_v20 = vmul.f32 %v2595_v33, %v2979_v13  ;;  %v3138_v61 = vmul.f32 %v2610_v42, %v557_v50  ;;  %v3157_v50 = vld [vmem:[#allocation2 + $0x108] sm:$0xff] }
 0x14c   : > { %v871_v14 = vadd.f32 %v819_v60, %v730_v3  ;;  %v1418_v41 = vrot.slane %v1359_v45, 2  ;;  %v946_v34 = vmul.f32 %v2604_v37, %v3064_v47  ;;  %v683_v8 = vrot.slane %v644_v10, 1  ;;  %v3180_v45 = vld [vmem:[#allocation2 + $0x110] sm:$0xff] }
 0x14d   : > { %1495 = vst.msk [vmem:[%s2575_s29 + $0x49] sm:$0x80] %vm1478_vm3, %v1469_v55  ;;  %v1222_v18 = vadd.f32 %v1198_v5, %v1170_v35  ;;  %v820_v9 = vrot.slane %v759_v20, 2  ;;  %v1060_v19 = vmul.f32 %v2610_v42, %v3064_v47  ;;  %v828_v22 = vrot.slane %v3124_v25, 2 }
 0x14e   : > { %v923_v11 = vadd.f32 %v899_v58, %v871_v14  ;;  %v1119_v28 = vsel %vm789_vm2, %v1116_v17, %v1118_v16  ;;  %v1199_v43 = vmul.f32 %v2617_v48, %v3084_v63  ;;  %v1419_v24 = vsel %vm789_vm2, %v1416_v23, %v1418_v41 }
 0x14f   : > { %v1330_v12 = vadd.f32 %v1283_v59, %v1222_v18  ;;  %v731_v46 = vadd.f32 %v683_v8, %v3028_v39  ;;  %v984_v29 = vrot.slane %v946_v34, 1  ;;  %v1200_v52 = vmul.f32 %v2617_v48, %v558_v26 }
 0x150   : > { %v1031_v53 = vadd.f32 %v982_v2, %v923_v11  ;;  %v599_v7 = vmul.f32 %v2591_v31, %v2979_v13  ;;  %v645_v17 = vmul.f32 %v2593_v32, %v3008_v40  ;;  %v1120_v1 = vrot.slane %v1060_v19, 2 }
 0x151   : > { %v1470_v16 = vadd.f32 %v1417_v56, %v1330_v12  ;;  %v872_v62 = vadd.f32 %v820_v9, %v731_v46  ;;  %v760_v23 = vmul.f32 %v2595_v33, %v3008_v40  ;;  %v1246_v2 = vmul.f32 %v2619_v49, %v3157_v50 }
 0x152   : > { %v1171_v39 = vadd.f32 %v1119_v28, %v1031_v53  ;;  %v623_v13 = vadd.f32 %v3166_v38, %v599_v7  ;;  %v684_v30 = vrot.slane %v645_v17, 1  ;;  %v1360_v59 = vmul.f32 %v2630_v57, %v3157_v50  ;;  %v561_v17 = vld [vmem:[#allocation2 + $0x118] sm:$0xff] }
 0x153   : > { %1496 = vst.msk [vmem:[%s2575_s29 + $0x51] sm:$0xff] %vm435_vm0, %v1470_v16  ;;  %v924_v5 = vadd.f32 %v900_v51, %v872_v62  ;;  %v821_v44 = vrot.slane %v760_v23, 2  ;;  %v947_v0 = vmul.f32 %v2604_v37, %v3084_v63  ;;  %v901_v56 = vmul.f32 %v2602_v36, %v3064_v47 }
 0x154   : > { %v1223_v15 = vadd.f32 %v1199_v43, %v1171_v39  ;;  %v685_v60 = vsel %vm664_vm1, %v683_v8, %v684_v30  ;;  %v1061_v3 = vmul.f32 %v2610_v42, %v3084_v63  ;;  %v3187_v14 = vmul.f32 %v2619_v49, %v3180_v45 }
 0x155   : > { %v1032_v58 = vadd.f32 %v984_v29, %v924_v5  ;;  %v732_v51 = vadd.f32 %v685_v60, %v623_v13  ;;  %v822_v55 = vsel %vm789_vm2, %v820_v9, %v821_v44  ;;  %v985_v35 = vrot.slane %v947_v0, 1  ;;  %v562_v13 = vld [vmem:[#allocation2 + $0x120] sm:$0xff] }
 0x156   : > { %v1331_v10 = vadd.f32 %v1282_v6, %v1223_v15  ;;  %v1121_v20 = vrot.slane %v1061_v3, 2  ;;  %v1361_v41 = vmul.f32 %v2630_v57, %v3180_v45  ;;  %v1284_v18 = vrot.slane %v1246_v2, 1 }
 0x157   : > { %v1172_v34 = vadd.f32 %v1120_v1, %v1032_v58  ;;  %v873_v8 = vadd.f32 %v822_v55, %v732_v51  ;;  %v600_v19 = vmul.f32 %v2591_v31, %v3008_v40  ;;  %v1123_v9 = vrot.slane %v3138_v61, 2  ;;  %v563_v51 = vld [vmem:[#allocation2 + $0x128] sm:$0xff] }
 0x158   : > { %v1471_v11 = vadd.f32 %v1419_v24, %v1331_v10  ;;  %v986_v27 = vsel %vm664_vm1, %v984_v29, %v985_v35  ;;  %v1285_v6 = vrot.slane %v3187_v14, 1  ;;  %v1420_v43 = vrot.slane %v1360_v59, 2 }
 0x159   : > { %v1224_v28 = vadd.f32 %v1200_v52, %v1172_v34  ;;  %v925_v12 = vadd.f32 %v901_v56, %v873_v8  ;;  %v624_v46 = vadd.f32 %v3166_v38, %v600_v19  ;;  %v1122_v53 = vsel %vm789_vm2, %v1120_v1, %v1121_v20 }
 0x15a   : > { %1497 = vst.msk [vmem:[%s2575_s29 + $0x59] sm:$0x7f] %vm1481_vm4, %v1471_v11  ;;  %v1201_v7 = vmul.f32 %v2617_v48, %v3157_v50  ;;  %v1421_v40 = vrot.slane %v1361_v41, 2  ;;  %v824_v61 = vsel %vm789_vm2, %v821_v44, %v823_v4  ;;  %v902_v16 = vmul.f32 %v2602_v36, %v3084_v63 }
 0x15b   : > { %v1332_v24 = vadd.f32 %v1284_v18, %v1224_v28  ;;  %v1033_v29 = vadd.f32 %v986_v27, %v925_v12  ;;  %v733_v52 = vadd.f32 %v684_v30, %v624_v46  ;;  %v903_v62 = vmul.f32 %v2602_v36, %v558_v26 }
 0x15c   : > { %v1286_v1 = vsel %vm664_vm1, %v1284_v18, %v1285_v6  ;;  %v1362_v23 = vmul.f32 %v2630_v57, %v561_v17  ;;  %v646_v54 = vmul.f32 %v2593_v32, %v3064_v47  ;;  %v762_v30 = vmul.f32 %v2595_v33, %v3064_v47 }
 0x15d   : > { %v1472_v4 = vadd.f32 %v1420_v43, %v1332_v24  ;;  %v1173_v39 = vadd.f32 %v1122_v53, %v1033_v29  ;;  %v874_v2 = vadd.f32 %v824_v61, %v733_v52  ;;  %v1422_v5 = vsel %vm789_vm2, %v1420_v43, %v1421_v40 }
 0x15e   : > { %v1423_v59 = vrot.slane %v1362_v23, 2  ;;  %v686_v26 = vrot.slane %v646_v54, 1  ;;  %v948_v44 = vmul.f32 %v2604_v37, %v3157_v50  ;;  %v825_v60 = vrot.slane %v762_v30, 2 }
 0x15f   : > { %1498 = vst.msk [vmem:[%s2575_s29 + $0x59] sm:$0x80] %vm1478_vm3, %v1472_v4  ;;  %v1225_v0 = vadd.f32 %v1201_v7, %v1173_v39  ;;  %v926_v15 = vadd.f32 %v902_v16, %v874_v2  ;;  %v1063_v56 = vmul.f32 %v2610_v42, %v3157_v50  ;;  %v1124_v3 = vsel %vm789_vm2, %v1121_v20, %v1123_v9 }
 0x160   : > { %v1202_v58 = vmul.f32 %v2617_v48, %v3180_v45  ;;  %v734_v55 = vadd.f32 %v686_v26, %v3113_v21  ;;  %v1203_v10 = vmul.f32 %v2617_v48, %v562_v13  ;;  %v1424_v18 = vsel %vm789_vm2, %v1421_v40, %v1423_v59  ;;  %v564_v40 = vld [vmem:[#allocation2 + $0x130] sm:$0xff] }
 0x161   : > { %v1333_v41 = vadd.f32 %v1286_v1, %v1225_v0  ;;  %v1034_v34 = vadd.f32 %v985_v35, %v926_v15  ;;  %v987_v8 = vrot.slane %v948_v44, 1  ;;  %v602_v11 = vmul.f32 %v2591_v31, %v3064_v47 }
 0x162   : > { %v875_v19 = vadd.f32 %v825_v60, %v734_v55  ;;  %v647_v20 = vmul.f32 %v2593_v32, %v3084_v63  ;;  %v763_v9 = vmul.f32 %v2595_v33, %v3084_v63  ;;  %v1125_v28 = vrot.slane %v1063_v56, 2 }
 0x163   : > { %v1473_v27 = vadd.f32 %v1422_v5, %v1333_v41  ;;  %v1174_v21 = vadd.f32 %v1124_v3, %v1034_v34  ;;  %v1248_v43 = vmul.f32 %v2619_v49, %v563_v51  ;;  %v626_v35 = vadd.f32 %v3166_v38, %v602_v11 }
 0x164   : > { %v927_v12 = vadd.f32 %v903_v62, %v875_v19  ;;  %v687_v46 = vrot.slane %v647_v20, 1  ;;  %v826_v53 = vrot.slane %v763_v9, 2  ;;  %v1363_v47 = vmul.f32 %v2630_v57, %v563_v51 }
 0x165   : > { %1499 = vst.msk [vmem:[%s2575_s29 + $0x61] sm:$0xff] %vm435_vm0, %v1473_v27  ;;  %v1226_v7 = vadd.f32 %v1202_v58, %v1174_v21  ;;  %v949_v32 = vmul.f32 %v2604_v37, %v3180_v45  ;;  %v1064_v33 = vmul.f32 %v2610_v42, %v3180_v45  ;;  %v904_v52 = vmul.f32 %v2602_v36, %v3157_v50 }
 0x166   : > { %v1035_v61 = vadd.f32 %v987_v8, %v927_v12  ;;  %v688_v24 = vsel %vm664_vm1, %v686_v26, %v687_v46  ;;  %v827_v29 = vsel %vm789_vm2, %v825_v60, %v826_v53  ;;  %v1287_v37 = vrot.slane %v1248_v43, 1 }
 0x167   : > { %v1334_v16 = vadd.f32 %v1285_v6, %v1226_v7  ;;  %v735_v62 = vadd.f32 %v688_v24, %v626_v35  ;;  %v988_v1 = vrot.slane %v949_v32, 1  ;;  %v1126_v23 = vrot.slane %v1064_v33, 2 }
 0x168   : > { %v1175_v54 = vadd.f32 %v1125_v28, %v1035_v61  ;;  %v1249_v4 = vmul.f32 %v2619_v49, %v564_v40  ;;  %v603_v39 = vmul.f32 %v2591_v31, %v3084_v63  ;;  %v1065_v2 = vmul.f32 %v2610_v42, %v561_v17  ;;  %v565_v17 = vld [vmem:[#allocation2 + $0x138] sm:$0xff] }
 0x169   : > { %v1474_v13 = vadd.f32 %v1424_v18, %v1334_v16  ;;  %v1425_v30 = vrot.slane %v1363_v47, 2  ;;  %v876_v5 = vadd.f32 %v827_v29, %v735_v62  ;;  %v989_v14 = vsel %vm664_vm1, %v987_v8, %v988_v1 }
 0x16a   : > { %v1227_v50 = vadd.f32 %v1203_v10, %v1175_v54  ;;  %v1364_v6 = vmul.f32 %v2630_v57, %v564_v40  ;;  %v627_v59 = vadd.f32 %v3166_v38, %v603_v39  ;;  %v1127_v49 = vsel %vm789_vm2, %v1125_v28, %v1126_v23 }
 0x16b   : > { %1500 = vst.msk [vmem:[%s2575_s29 + $0x69] sm:$0x7f] %vm1481_vm4, %v1474_v13  ;;  %v928_v26 = vadd.f32 %v904_v52, %v876_v5  ;;  %v829_v31 = vsel %vm789_vm2, %v826_v53, %v828_v22  ;;  %v1288_v63 = vrot.slane %v1249_v4, 1  ;;  %v905_v0 = vmul.f32 %v2602_v36, %v3180_v45 }
 0x16c   : > { %v1335_v42 = vadd.f32 %v1287_v37, %v1227_v50  ;;  %v736_v44 = vadd.f32 %v687_v46, %v627_v59  ;;  %v1128_v38 = vrot.slane %v1065_v2, 2  ;;  %v1204_v60 = vmul.f32 %v2617_v48, %v563_v51 }
 0x16d   : > { %v1036_v15 = vadd.f32 %v989_v14, %v928_v26  ;;  %v1426_v3 = vrot.slane %v1364_v6, 2  ;;  %v1365_v25 = vmul.f32 %v2630_v57, %v565_v17  ;;  %v1289_v22 = vsel %vm664_vm1, %v1287_v37, %v1288_v63 }
 0x16e   : > { %v1475_v56 = vadd.f32 %v1425_v30, %v1335_v42  ;;  %v877_v58 = vadd.f32 %v829_v31, %v736_v44  ;;  %v1129_v45 = vsel %vm789_vm2, %v1126_v23, %v1128_v38  ;;  %v1205_v34 = vmul.f32 %v2617_v48, %v564_v40 }
 0x16f   : > { %v1176_v55 = vadd.f32 %v1127_v49, %v1036_v15  ;;  %v1427_v51 = vsel %vm789_vm2, %v1425_v30, %v1426_v3  ;;  %v1428_v18 = vrot.slane %v1365_v25, 2 }
 0x170   : > { %1501 = vst.msk [vmem:[%s2575_s29 + $0x69] sm:$0x80] %vm1478_vm3, %v1475_v56  ;;  %v929_v10 = vadd.f32 %v905_v0, %v877_v58 }
 0x171   : > { %v1228_v36 = vadd.f32 %v1204_v60, %v1176_v55  ;;  %v1429_v20 = vsel %vm789_vm2, %v1426_v3, %v1428_v18 }
 0x172   : > { %v1037_v41 = vadd.f32 %v988_v1, %v929_v10 }
 0x173   : > { %v1336_v57 = vadd.f32 %v1289_v22, %v1228_v36 }
 0x174   : > { %v1177_v8 = vadd.f32 %v1129_v45, %v1037_v41 }
 0x175   : > { %v1476_v19 = vadd.f32 %v1427_v51, %v1336_v57 }
 0x176   : > { %v1229_v11 = vadd.f32 %v1205_v34, %v1177_v8 }
 0x177   : > { %1502 = vst.msk [vmem:[%s2575_s29 + $0x71] sm:$0xff] %vm435_vm0, %v1476_v19 }
 0x178   : > { %v1337_v9 = vadd.f32 %v1288_v63, %v1229_v11 }
 0x17a   : > { %v1477_v48 = vadd.f32 %v1429_v20, %v1337_v9 }
 0x17c   : > { %1503 = vst.msk [vmem:[%s2575_s29 + $0x79] sm:$0x7f] %vm1481_vm4, %v1477_v48 }
 0x17d   : > { %2022 = shalt.err (!%p2019_p9)
}
 0x17e   : > { %s2023_s29 = scalar_lea.hbm %s3282_s30, 2048  ;;  %s2027_s0 = scalar_lea.hbm %s3452_s1, 8192 }
 0x17f   : > { %p2024_p12 = scmp.ne.s32.totalorder %s3282_s30, %s2023_s29  ;;  %p2028_p6 = scmp.lt.s32.totalorder %s3282_s30, %s3452_s1 }
 0x180   : > { %p2029_p4 = scmp.lt.s32.totalorder %s2027_s0, %s2023_s29 }
 0x181   : > { %p2025_p5 = pnand %p2024_p12, %p3453_p7 }
 0x182   : > { %p2030_p2 = por %p2029_p4, %p2028_p6 }
 0x183   : > { %p2026_p13 = pneg %p2025_p5 }
 0x185   : > { %p2031_p1 = pnand %p2030_p2, %p2026_p13 }
 0x187   : > { %2034 = shalt.err (!%p2031_p1)
}
 0x188   : > { %s2177_s3 = smov 128   ;;  %s2178_s28 = smov 8  }
 0x189   : > { %1754 = dma.vmem_to_hbm [thread:$0]  (%p3453_p7), %s3284_s10, 2048, %s3282_s30, %s1505_s2, %s2177_s3, %s2177_s3, %s2178_s28  }
 0x18a PF: > { %p1777_p0 = scmp.ge.s32.totalorder %s2165_s6, 2  ;;  %s1537_s26 = sand.u32 1, %s2137_s24  }
 0x18b   : > { %p3454_p3 = scmp.ne.s32.totalorder %s3423_s16, 0  ;;  %s1538_s19 = scalar_lea.sflag [#allocation5], %s1537_s26 }
 0x18d   : > { %p1771_p8 = pnand %p1777_p0, %p3454_p3 }
 0x18f   : > { %p1772_p10 = pneg %p1771_p8 }
 0x191   : > { %2108 = dma.done.wait (%p1772_p10), %s1538_s19, 2048  }
 0x192   : > { %2110 = vsyncadd (%p1772_p10), %s1538_s19, 4294965248  ;;  %s25_s6 = sadd.s32 1, %s2165_s6   ;;  %s3456_s18 = sld [smem:[#allocation18_spill]] }
 0x193   : > { %p3316_p11 = scmp.ge.s32.totalorder %s25_s6, 6   ;;  %s3457_s19 = sld [smem:[#allocation19_spill]] }
 0x194   : > { %s3458_s15 = sld [smem:[#allocation20_spill]]  ;;  %s3466_s21 = smov %s2129_s22 }
 0x195   : > { %s3459_s23 = sld [smem:[#allocation30_spill]]  ;;  %s3468_s24 = smov %s2141_s25 }
 0x196   : > { %s3460_s10 = sld [smem:[#allocation21_spill]] }
 0x197   : > { %s3461_s26 = sld [smem:[#allocation31_spill]] }
 0x198   : > { %s3462_s27 = sld [smem:[#allocation24_spill]]  ;;  %24 = sbr.rel (!%p3316_p11) target bundleno = 20 (0x14), region = 127 }
 0x199   : > { %s3463_s28 = sld [smem:[#allocation25_spill]] }
 0x19a   : > { %s3464_s29 = sld [smem:[#allocation26_spill]]  ;;  %s3467_s22 = smov %s3458_s15 }
 0x19b   : > { %s3465_s30 = sld [smem:[#allocation27_spill]] }
 0x19c   : > { %s3469_s25 = smov %s3460_s10 }
 0x19d   :  { %1543 = vsyncpa [#allocation4], 1 }
 0x19e   :  { %1545 = vsyncpa [#allocation4 + $0x1], 1 }
 0x19f   :  { %1546 = vsyncpa [#allocation7], 1 }
 0x1a0   :  { %1548 = vsyncpa [#allocation7 + $0x1], 1 }
 0x1a1   :  { %1549 = vsyncpa [#allocation10], 1 }
 0x1a2   :  { %1550 = vsyncpa [#allocation5], 1 }
 0x1a3   :  { %1552 = vsyncpa [#allocation5 + $0x1], 1 }

</bundles_post_ra>
